<compile_context>
chip_gen: v5e
topology: v5e:2x2
jax: 0.10.0
libtpu: 0.0.40
codegen_flags: <defaults>
</compile_context>

<pallas_src>
import functools

import jax
import jax.numpy as jnp
from jax import lax
from jax.experimental import pallas as pl
from jax.experimental.pallas import tpu as pltpu


def _round_up(x, m):
    return ((x + m - 1) // m) * m


# ----------------------------- Pallas kernel ------------------------------ #

def _conv3x3s2_kernel(x_ref, w_ref, b_ref, o_ref, *, th, wo_pad, kin):
    """One row-tile of a 3x3 / stride-2 / pad-1 conv + bias + ReLU.

    x_ref : (1, hq, wq, 4*cin)    phase-packed zero-padded input; lane group
                                  g = 2*(h%2) + (w%2) holds xpad[2h'+g//2, 2w'+g%2, :]
    w_ref : (4, 4*cin, cout)      folded weights, one (4*cin, cout) matrix per
                                  spatial shift (u, v) in {0,1}^2 (rows of
                                  non-contributing phases are zero)
    b_ref : (1, cout)             bias (f32)
    o_ref : (1, th, wo_pad, cout) output rows [t*th, (t+1)*th) of this image
    """
    t = pl.program_id(1)
    m = th * wo_pad
    cout = o_ref.shape[-1]

    # shift (u, v) = (0, 0)
    slab = x_ref[0, pl.ds(t * th, th), 0:wo_pad, :]
    acc = jnp.dot(slab.reshape(m, kin), w_ref[0],
                  preferred_element_type=jnp.float32)
    # remaining 3 spatial shifts
    for u, v in ((0, 1), (1, 0), (1, 1)):
        slab = x_ref[0, pl.ds(t * th + u, th), v:v + wo_pad, :]
        acc = acc + jnp.dot(slab.reshape(m, kin), w_ref[2 * u + v],
                            preferred_element_type=jnp.float32)

    y = jnp.maximum(acc + b_ref[...], 0.0)
    o_ref[0] = y.reshape(th, wo_pad, cout)


# --------------------------- conv stage wrapper ---------------------------- #

def _phase_pack(x_nhwc, wo_pad, dtype):
    """NHWC -> zero-padded, phase-packed (B, ho+1, wo_pad+1, 4*C) in `dtype`.

    Single fused XLA pass (pad + space-to-depth + cast); last dim packs the
    four stride-2 phases so the kernel's matmul lane dim is 4*C.
    """
    B, H, W, C = x_nhwc.shape
    ho = H // 2
    hq, wq = ho + 1, wo_pad + 1
    xp = jnp.pad(x_nhwc, ((0, 0), (1, 1), (1, 2 * wq - 1 - W), (0, 0)))
    xp = xp.reshape(B, hq, 2, wq, 2, C).transpose(0, 1, 3, 2, 4, 5)
    return xp.reshape(B, hq, wq, 4 * C).astype(dtype)


def conv3x3_s2_relu(x_nhwc, w4, bias, *, row_tile):
    """3x3 / stride-2 / pad-1 conv + bias + ReLU via the Pallas kernel."""
    B, H, W, C = x_nhwc.shape
    assert H % 2 == 0 and W % 2 == 0, "even spatial dims expected (stride 2)"
    ho, wo = H // 2, W // 2
    wo_pad = _round_up(wo, 16)            # 16 keeps bf16 sublane regroups trivial
    th = min(row_tile, ho)
    while ho % th:                        # keep row tile a divisor of ho
        th -= 1
    nt = ho // th
    kin = 4 * C
    cout = w4.shape[-1]
    hq, wq = ho + 1, wo_pad + 1

    xph = _phase_pack(x_nhwc, wo_pad, w4.dtype)   # bf16 operands -> half the DMA

    kernel = functools.partial(_conv3x3s2_kernel, th=th, wo_pad=wo_pad, kin=kin)
    y = pl.pallas_call(
        kernel,
        out_shape=jax.ShapeDtypeStruct((B, ho, wo_pad, cout), jnp.float32),
        grid_spec=pltpu.PrefetchScalarGridSpec(
            num_scalar_prefetch=0,
            grid=(B, nt),                                   # batch x row tiles
            in_specs=[
                pl.BlockSpec((1, hq, wq, kin), lambda b, t: (b, 0, 0, 0)),
                pl.BlockSpec((4, kin, cout), lambda b, t: (0, 0, 0)),
                pl.BlockSpec((1, cout), lambda b, t: (0, 0)),
            ],
            out_specs=pl.BlockSpec((1, th, wo_pad, cout),
                                   lambda b, t: (b, t, 0, 0)),
        ),
        compiler_params=pltpu.CompilerParams(
            dimension_semantics=("parallel", "parallel")),
    )(xph, w4, bias)

    # Drop the garbage spatial-pad columns (they hold ReLU(bias)); this slice
    # fuses into the next stage's phase-pack / the NCHW transpose.
    return y[:, :, :wo, :]                # (B, ho, wo, cout) NHWC, f32


# ------------------------------ forward pass ------------------------------- #

@functools.partial(jax.jit, static_argnums=(2,))
def _forward(x_nchw, packed, row_tile):
    x = jnp.transpose(x_nchw, (0, 2, 3, 1))            # NCHW -> NHWC once
    feats = []
    for w4, b in packed:
        x = conv3x3_s2_relu(x, w4, b, row_tile=row_tile)
        feats.append(x)
    # single NHWC -> NCHW conversion per returned feature (API contract)
    return [jnp.transpose(f, (0, 3, 1, 2)) for f in feats]


# ------------------------- FeatureExtractor module ------------------------- #

class FeatureExtractor:
    """Synthetic multi-scale feature backbone (NCHW in, list of NCHW out)."""

    def __init__(self, key, in_chans=3, requires_grad=True,
                 compute_dtype=jnp.bfloat16, row_tile=64):
        self.requires_grad = requires_grad   # forward only; no grad tracking
        self.compute_dtype = compute_dtype
        self.row_tile = row_tile
        chans = [in_chans, 16, 32, 64]
        self.out_dims = chans[1:]
        self.params = []                     # true (w_hwio, b) for the reference
        packed = []
        for stage in range(3):
            key, kw_, kb_ = jax.random.split(key, 3)
            cin, cout = chans[stage], chans[stage + 1]
            fan_in = 9 * cin
            w = jax.random.normal(kw_, (3, 3, cin, cout), jnp.float32)
            w = w * (2.0 / fan_in) ** 0.5
            b = 0.01 * jax.random.normal(kb_, (cout,), jnp.float32)
            self.params.append((w, b))

            # Fold the 9 taps into 4 shift matrices: for spatial shift (u, v),
            # lane group g = 2r+s carries tap (di, dj) = (2u+r, 2v+s) when that
            # tap exists, else zero rows.
            w4 = jnp.zeros((4, 4 * cin, cout), jnp.float32)
            for u in range(2):
                for v in range(2):
                    for r in range(2):
                        for s in range(2):
                            di, dj = 2 * u + r, 2 * v + s
                            if di <= 2 and dj <= 2:
                                g = 2 * r + s
                                w4 = w4.at[2 * u + v,
                                           g * cin:(g + 1) * cin, :].set(w[di, dj])
            packed.append((w4.astype(compute_dtype),
                           b.reshape(1, cout).astype(jnp.float32)))
        self._packed = tuple(packed)

    def __call__(self, inputs_nchw):
        # inputs: (B, C, H, W) — same contract as the PyTorch module.
        return _forward(inputs_nchw, self._packed, self.row_tile)


# ------------------------------ reference ---------------------------------- #

def _reference(inputs_nchw, params, compute_dtype):
    """XLA conv reference with the same bf16-operand / f32-accumulate numerics."""
    x = jnp.transpose(inputs_nchw, (0, 2, 3, 1)).astype(jnp.float32)
    feats = []
    for w, b in params:
        y = lax.conv_general_dilated(
            x.astype(compute_dtype), w.astype(compute_dtype),
            window_strides=(2, 2), padding=((1, 1), (1, 1)),
            dimension_numbers=("NHWC", "HWIO", "NHWC"),
            preferred_element_type=jnp.float32)
        x = jnp.maximum(y + b, 0.0)
        feats.append(jnp.transpose(x, (0, 3, 1, 2)))
    return feats


# --------------------------------- main ------------------------------------ #

if __name__ == "__main__":
    key = jax.random.PRNGKey(0)
    key, kx = jax.random.split(key)

    B, C, H, W = 2, 3, 16, 16
    x = jax.random.normal(kx, (B, C, H, W), jnp.float32)

    # row_tile=4 exercises the multi-row-tile grid path on the 16x16 test image.
    model = FeatureExtractor(key, in_chans=C, requires_grad=False, row_tile=4)

    feats = model(x)
    feats = [jax.block_until_ready(f) for f in feats]

    ref = _reference(x, model.params, model.compute_dtype)
    expected_shapes = [(B, 16, H // 2, W // 2),
                       (B, 32, H // 4, W // 4),
                       (B, 64, H // 8, W // 8)]
    ok = True
    for f, r, s in zip(feats, ref, expected_shapes):
        ok &= (f.shape == s)
        ok &= bool(jnp.allclose(f, r, atol=2e-3, rtol=2e-3))

    if ok:
        print("KERNEL_OK")
    else:
        print("KERNEL_MISMATCH")
</pallas_src>

<mosaic_0001>
module attributes {stable_mosaic.version = 11 : i64} {
  func.func @_conv3x3s2_kernel(%arg0: i32, %arg1: i32, %arg2: memref<1x9x17x12xbf16, #tpu.memory_space<vmem>>, %arg3: memref<4x12x16xbf16, #tpu.memory_space<vmem>>, %arg4: memref<1x16xf32, #tpu.memory_space<vmem>>, %arg5: memref<1x4x16x16xf32, #tpu.memory_space<vmem>>) attributes {dimension_semantics = [#tpu.dimension_semantics<parallel>, #tpu.dimension_semantics<parallel>], iteration_bounds = array<i64: 2, 2>, scalar_prefetch = 0 : i64, scratch_operands = 0 : i64, tpu.core_type = #tpu.core_type<tc>, window_params = [{transform_indices = @transform_0, window_bounds = array<i64: 1, 9, 17, 12>}, {pipeline_mode = #tpu.pipeline_mode<synchronous>, transform_indices = @transform_1, window_bounds = array<i64: 4, 12, 16>}, {pipeline_mode = #tpu.pipeline_mode<synchronous>, transform_indices = @transform_2, window_bounds = array<i64: 1, 16>}, {transform_indices = @transform_3, window_bounds = array<i64: 1, 4, 16, 16>}]} {
    %c4_i32 = arith.constant 4 : i32
    %0 = arith.muli %arg1, %c4_i32 : i32
    %c0 = arith.constant 0 : index
    %1 = arith.index_cast %0 : i32 to index
    %c0_0 = arith.constant 0 : index
    %c0_1 = arith.constant 0 : index
    %2 = vector.load %arg2[%c0, %1, %c0_0, %c0_1] : memref<1x9x17x12xbf16, #tpu.memory_space<vmem>>, vector<1x4x16x12xbf16>
    %3 = vector.shape_cast %2 : vector<1x4x16x12xbf16> to vector<4x16x12xbf16>
    %4 = vector.shape_cast %3 : vector<4x16x12xbf16> to vector<64x12xbf16>
    %c0_2 = arith.constant 0 : index
    %c0_3 = arith.constant 0 : index
    %c0_4 = arith.constant 0 : index
    %5 = vector.load %arg3[%c0_2, %c0_3, %c0_4] : memref<4x12x16xbf16, #tpu.memory_space<vmem>>, vector<1x12x16xbf16>
    %6 = vector.shape_cast %5 : vector<1x12x16xbf16> to vector<12x16xbf16>
    %cst = arith.constant dense<0.000000e+00> : vector<64x16xf32>
    %7 = tpu.matmul %4, %6, %cst {dimension_numbers = #tpu.dot_dimension_numbers<[1], [0], [0], [1], [0, 0, 1, 1], [], []>} : vector<64x12xbf16>, vector<12x16xbf16>, vector<64x16xf32> -> vector<64x16xf32>
    %c4_i32_5 = arith.constant 4 : i32
    %8 = arith.muli %arg1, %c4_i32_5 : i32
    %c0_i32 = arith.constant 0 : i32
    %9 = arith.addi %8, %c0_i32 : i32
    %c0_6 = arith.constant 0 : index
    %10 = arith.index_cast %9 : i32 to index
    %c1 = arith.constant 1 : index
    %c0_7 = arith.constant 0 : index
    %11 = vector.load %arg2[%c0_6, %10, %c1, %c0_7] : memref<1x9x17x12xbf16, #tpu.memory_space<vmem>>, vector<1x4x16x12xbf16>
    %12 = vector.shape_cast %11 : vector<1x4x16x12xbf16> to vector<4x16x12xbf16>
    %13 = vector.shape_cast %12 : vector<4x16x12xbf16> to vector<64x12xbf16>
    %c1_8 = arith.constant 1 : index
    %c0_9 = arith.constant 0 : index
    %c0_10 = arith.constant 0 : index
    %14 = vector.load %arg3[%c1_8, %c0_9, %c0_10] : memref<4x12x16xbf16, #tpu.memory_space<vmem>>, vector<1x12x16xbf16>
    %15 = vector.shape_cast %14 : vector<1x12x16xbf16> to vector<12x16xbf16>
    %cst_11 = arith.constant dense<0.000000e+00> : vector<64x16xf32>
    %16 = tpu.matmul %13, %15, %cst_11 {dimension_numbers = #tpu.dot_dimension_numbers<[1], [0], [0], [1], [0, 0, 1, 1], [], []>} : vector<64x12xbf16>, vector<12x16xbf16>, vector<64x16xf32> -> vector<64x16xf32>
    %17 = arith.addf %7, %16 : vector<64x16xf32>
    %c4_i32_12 = arith.constant 4 : i32
    %18 = arith.muli %arg1, %c4_i32_12 : i32
    %c1_i32 = arith.constant 1 : i32
    %19 = arith.addi %18, %c1_i32 : i32
    %c0_13 = arith.constant 0 : index
    %20 = arith.index_cast %19 : i32 to index
    %c0_14 = arith.constant 0 : index
    %c0_15 = arith.constant 0 : index
    %21 = vector.load %arg2[%c0_13, %20, %c0_14, %c0_15] : memref<1x9x17x12xbf16, #tpu.memory_space<vmem>>, vector<1x4x16x12xbf16>
    %22 = vector.shape_cast %21 : vector<1x4x16x12xbf16> to vector<4x16x12xbf16>
    %23 = vector.shape_cast %22 : vector<4x16x12xbf16> to vector<64x12xbf16>
    %c2 = arith.constant 2 : index
    %c0_16 = arith.constant 0 : index
    %c0_17 = arith.constant 0 : index
    %24 = vector.load %arg3[%c2, %c0_16, %c0_17] : memref<4x12x16xbf16, #tpu.memory_space<vmem>>, vector<1x12x16xbf16>
    %25 = vector.shape_cast %24 : vector<1x12x16xbf16> to vector<12x16xbf16>
    %cst_18 = arith.constant dense<0.000000e+00> : vector<64x16xf32>
    %26 = tpu.matmul %23, %25, %cst_18 {dimension_numbers = #tpu.dot_dimension_numbers<[1], [0], [0], [1], [0, 0, 1, 1], [], []>} : vector<64x12xbf16>, vector<12x16xbf16>, vector<64x16xf32> -> vector<64x16xf32>
    %27 = arith.addf %17, %26 : vector<64x16xf32>
    %c4_i32_19 = arith.constant 4 : i32
    %28 = arith.muli %arg1, %c4_i32_19 : i32
    %c1_i32_20 = arith.constant 1 : i32
    %29 = arith.addi %28, %c1_i32_20 : i32
    %c0_21 = arith.constant 0 : index
    %30 = arith.index_cast %29 : i32 to index
    %c1_22 = arith.constant 1 : index
    %c0_23 = arith.constant 0 : index
    %31 = vector.load %arg2[%c0_21, %30, %c1_22, %c0_23] : memref<1x9x17x12xbf16, #tpu.memory_space<vmem>>, vector<1x4x16x12xbf16>
    %32 = vector.shape_cast %31 : vector<1x4x16x12xbf16> to vector<4x16x12xbf16>
    %33 = vector.shape_cast %32 : vector<4x16x12xbf16> to vector<64x12xbf16>
    %c3 = arith.constant 3 : index
    %c0_24 = arith.constant 0 : index
    %c0_25 = arith.constant 0 : index
    %34 = vector.load %arg3[%c3, %c0_24, %c0_25] : memref<4x12x16xbf16, #tpu.memory_space<vmem>>, vector<1x12x16xbf16>
    %35 = vector.shape_cast %34 : vector<1x12x16xbf16> to vector<12x16xbf16>
    %cst_26 = arith.constant dense<0.000000e+00> : vector<64x16xf32>
    %36 = tpu.matmul %33, %35, %cst_26 {dimension_numbers = #tpu.dot_dimension_numbers<[1], [0], [0], [1], [0, 0, 1, 1], [], []>} : vector<64x12xbf16>, vector<12x16xbf16>, vector<64x16xf32> -> vector<64x16xf32>
    %37 = arith.addf %27, %36 : vector<64x16xf32>
    %c0_27 = arith.constant 0 : index
    %c0_28 = arith.constant 0 : index
    %38 = vector.load %arg4[%c0_27, %c0_28] : memref<1x16xf32, #tpu.memory_space<vmem>>, vector<1x16xf32>
    %39 = vector.broadcast %38 : vector<1x16xf32> to vector<64x16xf32>
    %40 = arith.addf %37, %39 : vector<64x16xf32>
    %cst_29 = arith.constant 0.000000e+00 : f32
    %41 = vector.broadcast %cst_29 : f32 to vector<64x16xf32>
    %42 = arith.maximumf %40, %41 : vector<64x16xf32>
    %43 = vector.shape_cast %42 : vector<64x16xf32> to vector<4x16x16xf32>
    %c0_30 = arith.constant 0 : index
    %c0_31 = arith.constant 0 : index
    %c0_32 = arith.constant 0 : index
    %c0_33 = arith.constant 0 : index
    %44 = vector.load %arg5[%c0_30, %c0_31, %c0_32, %c0_33] : memref<1x4x16x16xf32, #tpu.memory_space<vmem>>, vector<1x4x16x16xf32>
    %45 = vector.shape_cast %44 : vector<1x4x16x16xf32> to vector<4x16x16xf32>
    %46 = vector.shape_cast %43 : vector<4x16x16xf32> to vector<1x4x16x16xf32>
    tpu.vector_store %arg5[%c0_30, %c0_31, %c0_32, %c0_33], %46 {strides = array<i32>} : memref<1x4x16x16xf32, #tpu.memory_space<vmem>>, vector<1x4x16x16xf32>,
    return
  }
  func.func @transform_0(%arg0: i32, %arg1: i32) -> (i32, i32, i32, i32) {
    %c0_i32 = arith.constant 0 : i32
    %c0_i32_0 = arith.constant 0 : i32
    %c0_i32_1 = arith.constant 0 : i32
    %c0_i32_2 = arith.constant 0 : i32
    return %arg0, %c0_i32, %c0_i32_0, %c0_i32_1 : i32, i32, i32, i32
  }
  func.func @transform_1(%arg0: i32, %arg1: i32) -> (i32, i32, i32) {
    %c0_i32 = arith.constant 0 : i32
    %c0_i32_0 = arith.constant 0 : i32
    %c0_i32_1 = arith.constant 0 : i32
    %c0_i32_2 = arith.constant 0 : i32
    return %c0_i32, %c0_i32_0, %c0_i32_1 : i32, i32, i32
  }
  func.func @transform_2(%arg0: i32, %arg1: i32) -> (i32, i32) {
    %c0_i32 = arith.constant 0 : i32
    %c0_i32_0 = arith.constant 0 : i32
    %c0_i32_1 = arith.constant 0 : i32
    return %c0_i32, %c0_i32_0 : i32, i32
  }
  func.func @transform_3(%arg0: i32, %arg1: i32) -> (i32, i32, i32, i32) {
    %c0_i32 = arith.constant 0 : i32
    %c0_i32_0 = arith.constant 0 : i32
    %c0_i32_1 = arith.constant 0 : i32
    return %arg0, %arg1, %c0_i32, %c0_i32_0 : i32, i32, i32, i32
  }
}

module attributes {stable_mosaic.version = 11 : i64} {
  func.func @_conv3x3s2_kernel(%arg0: i32, %arg1: i32, %arg2: memref<1x5x17x64xbf16, #tpu.memory_space<vmem>>, %arg3: memref<4x64x32xbf16, #tpu.memory_space<vmem>>, %arg4: memref<1x32xf32, #tpu.memory_space<vmem>>, %arg5: memref<1x4x16x32xf32, #tpu.memory_space<vmem>>) attributes {dimension_semantics = [#tpu.dimension_semantics<parallel>, #tpu.dimension_semantics<parallel>], iteration_bounds = array<i64: 2, 1>, scalar_prefetch = 0 : i64, scratch_operands = 0 : i64, tpu.core_type = #tpu.core_type<tc>, window_params = [{transform_indices = @transform_0, window_bounds = array<i64: 1, 5, 17, 64>}, {pipeline_mode = #tpu.pipeline_mode<synchronous>, transform_indices = @transform_1, window_bounds = array<i64: 4, 64, 32>}, {pipeline_mode = #tpu.pipeline_mode<synchronous>, transform_indices = @transform_2, window_bounds = array<i64: 1, 32>}, {transform_indices = @transform_3, window_bounds = array<i64: 1, 4, 16, 32>}]} {
    %c4_i32 = arith.constant 4 : i32
    %0 = arith.muli %arg1, %c4_i32 : i32
    %c0 = arith.constant 0 : index
    %1 = arith.index_cast %0 : i32 to index
    %c0_0 = arith.constant 0 : index
    %c0_1 = arith.constant 0 : index
    %2 = vector.load %arg2[%c0, %1, %c0_0, %c0_1] : memref<1x5x17x64xbf16, #tpu.memory_space<vmem>>, vector<1x4x16x64xbf16>
    %3 = vector.shape_cast %2 : vector<1x4x16x64xbf16> to vector<4x16x64xbf16>
    %4 = vector.shape_cast %3 : vector<4x16x64xbf16> to vector<64x64xbf16>
    %c0_2 = arith.constant 0 : index
    %c0_3 = arith.constant 0 : index
    %c0_4 = arith.constant 0 : index
    %5 = vector.load %arg3[%c0_2, %c0_3, %c0_4] : memref<4x64x32xbf16, #tpu.memory_space<vmem>>, vector<1x64x32xbf16>
    %6 = vector.shape_cast %5 : vector<1x64x32xbf16> to vector<64x32xbf16>
    %cst = arith.constant dense<0.000000e+00> : vector<64x32xf32>
    %7 = tpu.matmul %4, %6, %cst {dimension_numbers = #tpu.dot_dimension_numbers<[1], [0], [0], [1], [0, 0, 1, 1], [], []>} : vector<64x64xbf16>, vector<64x32xbf16>, vector<64x32xf32> -> vector<64x32xf32>
    %c4_i32_5 = arith.constant 4 : i32
    %8 = arith.muli %arg1, %c4_i32_5 : i32
    %c0_i32 = arith.constant 0 : i32
    %9 = arith.addi %8, %c0_i32 : i32
    %c0_6 = arith.constant 0 : index
    %10 = arith.index_cast %9 : i32 to index
    %c1 = arith.constant 1 : index
    %c0_7 = arith.constant 0 : index
    %11 = vector.load %arg2[%c0_6, %10, %c1, %c0_7] : memref<1x5x17x64xbf16, #tpu.memory_space<vmem>>, vector<1x4x16x64xbf16>
    %12 = vector.shape_cast %11 : vector<1x4x16x64xbf16> to vector<4x16x64xbf16>
    %13 = vector.shape_cast %12 : vector<4x16x64xbf16> to vector<64x64xbf16>
    %c1_8 = arith.constant 1 : index
    %c0_9 = arith.constant 0 : index
    %c0_10 = arith.constant 0 : index
    %14 = vector.load %arg3[%c1_8, %c0_9, %c0_10] : memref<4x64x32xbf16, #tpu.memory_space<vmem>>, vector<1x64x32xbf16>
    %15 = vector.shape_cast %14 : vector<1x64x32xbf16> to vector<64x32xbf16>
    %cst_11 = arith.constant dense<0.000000e+00> : vector<64x32xf32>
    %16 = tpu.matmul %13, %15, %cst_11 {dimension_numbers = #tpu.dot_dimension_numbers<[1], [0], [0], [1], [0, 0, 1, 1], [], []>} : vector<64x64xbf16>, vector<64x32xbf16>, vector<64x32xf32> -> vector<64x32xf32>
    %17 = arith.addf %7, %16 : vector<64x32xf32>
    %c4_i32_12 = arith.constant 4 : i32
    %18 = arith.muli %arg1, %c4_i32_12 : i32
    %c1_i32 = arith.constant 1 : i32
    %19 = arith.addi %18, %c1_i32 : i32
    %c0_13 = arith.constant 0 : index
    %20 = arith.index_cast %19 : i32 to index
    %c0_14 = arith.constant 0 : index
    %c0_15 = arith.constant 0 : index
    %21 = vector.load %arg2[%c0_13, %20, %c0_14, %c0_15] : memref<1x5x17x64xbf16, #tpu.memory_space<vmem>>, vector<1x4x16x64xbf16>
    %22 = vector.shape_cast %21 : vector<1x4x16x64xbf16> to vector<4x16x64xbf16>
    %23 = vector.shape_cast %22 : vector<4x16x64xbf16> to vector<64x64xbf16>
    %c2 = arith.constant 2 : index
    %c0_16 = arith.constant 0 : index
    %c0_17 = arith.constant 0 : index
    %24 = vector.load %arg3[%c2, %c0_16, %c0_17] : memref<4x64x32xbf16, #tpu.memory_space<vmem>>, vector<1x64x32xbf16>
    %25 = vector.shape_cast %24 : vector<1x64x32xbf16> to vector<64x32xbf16>
    %cst_18 = arith.constant dense<0.000000e+00> : vector<64x32xf32>
    %26 = tpu.matmul %23, %25, %cst_18 {dimension_numbers = #tpu.dot_dimension_numbers<[1], [0], [0], [1], [0, 0, 1, 1], [], []>} : vector<64x64xbf16>, vector<64x32xbf16>, vector<64x32xf32> -> vector<64x32xf32>
    %27 = arith.addf %17, %26 : vector<64x32xf32>
    %c4_i32_19 = arith.constant 4 : i32
    %28 = arith.muli %arg1, %c4_i32_19 : i32
    %c1_i32_20 = arith.constant 1 : i32
    %29 = arith.addi %28, %c1_i32_20 : i32
    %c0_21 = arith.constant 0 : index
    %30 = arith.index_cast %29 : i32 to index
    %c1_22 = arith.constant 1 : index
    %c0_23 = arith.constant 0 : index
    %31 = vector.load %arg2[%c0_21, %30, %c1_22, %c0_23] : memref<1x5x17x64xbf16, #tpu.memory_space<vmem>>, vector<1x4x16x64xbf16>
    %32 = vector.shape_cast %31 : vector<1x4x16x64xbf16> to vector<4x16x64xbf16>
    %33 = vector.shape_cast %32 : vector<4x16x64xbf16> to vector<64x64xbf16>
    %c3 = arith.constant 3 : index
    %c0_24 = arith.constant 0 : index
    %c0_25 = arith.constant 0 : index
    %34 = vector.load %arg3[%c3, %c0_24, %c0_25] : memref<4x64x32xbf16, #tpu.memory_space<vmem>>, vector<1x64x32xbf16>
    %35 = vector.shape_cast %34 : vector<1x64x32xbf16> to vector<64x32xbf16>
    %cst_26 = arith.constant dense<0.000000e+00> : vector<64x32xf32>
    %36 = tpu.matmul %33, %35, %cst_26 {dimension_numbers = #tpu.dot_dimension_numbers<[1], [0], [0], [1], [0, 0, 1, 1], [], []>} : vector<64x64xbf16>, vector<64x32xbf16>, vector<64x32xf32> -> vector<64x32xf32>
    %37 = arith.addf %27, %36 : vector<64x32xf32>
    %c0_27 = arith.constant 0 : index
    %c0_28 = arith.constant 0 : index
    %38 = vector.load %arg4[%c0_27, %c0_28] : memref<1x32xf32, #tpu.memory_space<vmem>>, vector<1x32xf32>
    %39 = vector.broadcast %38 : vector<1x32xf32> to vector<64x32xf32>
    %40 = arith.addf %37, %39 : vector<64x32xf32>
    %cst_29 = arith.constant 0.000000e+00 : f32
    %41 = vector.broadcast %cst_29 : f32 to vector<64x32xf32>
    %42 = arith.maximumf %40, %41 : vector<64x32xf32>
    %43 = vector.shape_cast %42 : vector<64x32xf32> to vector<4x16x32xf32>
    %c0_30 = arith.constant 0 : index
    %c0_31 = arith.constant 0 : index
    %c0_32 = arith.constant 0 : index
    %c0_33 = arith.constant 0 : index
    %44 = vector.load %arg5[%c0_30, %c0_31, %c0_32, %c0_33] : memref<1x4x16x32xf32, #tpu.memory_space<vmem>>, vector<1x4x16x32xf32>
    %45 = vector.shape_cast %44 : vector<1x4x16x32xf32> to vector<4x16x32xf32>
    %46 = vector.shape_cast %43 : vector<4x16x32xf32> to vector<1x4x16x32xf32>
    tpu.vector_store %arg5[%c0_30, %c0_31, %c0_32, %c0_33], %46 {strides = array<i32>} : memref<1x4x16x32xf32, #tpu.memory_space<vmem>>, vector<1x4x16x32xf32>,
    return
  }
  func.func @transform_0(%arg0: i32, %arg1: i32) -> (i32, i32, i32, i32) {
    %c0_i32 = arith.constant 0 : i32
    %c0_i32_0 = arith.constant 0 : i32
    %c0_i32_1 = arith.constant 0 : i32
    %c0_i32_2 = arith.constant 0 : i32
    return %arg0, %c0_i32, %c0_i32_0, %c0_i32_1 : i32, i32, i32, i32
  }
  func.func @transform_1(%arg0: i32, %arg1: i32) -> (i32, i32, i32) {
    %c0_i32 = arith.constant 0 : i32
    %c0_i32_0 = arith.constant 0 : i32
    %c0_i32_1 = arith.constant 0 : i32
    %c0_i32_2 = arith.constant 0 : i32
    return %c0_i32, %c0_i32_0, %c0_i32_1 : i32, i32, i32
  }
  func.func @transform_2(%arg0: i32, %arg1: i32) -> (i32, i32) {
    %c0_i32 = arith.constant 0 : i32
    %c0_i32_0 = arith.constant 0 : i32
    %c0_i32_1 = arith.constant 0 : i32
    return %c0_i32, %c0_i32_0 : i32, i32
  }
  func.func @transform_3(%arg0: i32, %arg1: i32) -> (i32, i32, i32, i32) {
    %c0_i32 = arith.constant 0 : i32
    %c0_i32_0 = arith.constant 0 : i32
    %c0_i32_1 = arith.constant 0 : i32
    return %arg0, %arg1, %c0_i32, %c0_i32_0 : i32, i32, i32, i32
  }
}

module attributes {stable_mosaic.version = 11 : i64} {
  func.func @_conv3x3s2_kernel(%arg0: i32, %arg1: i32, %arg2: memref<1x3x17x128xbf16, #tpu.memory_space<vmem>>, %arg3: memref<4x128x64xbf16, #tpu.memory_space<vmem>>, %arg4: memref<1x64xf32, #tpu.memory_space<vmem>>, %arg5: memref<1x2x16x64xf32, #tpu.memory_space<vmem>>) attributes {dimension_semantics = [#tpu.dimension_semantics<parallel>, #tpu.dimension_semantics<parallel>], iteration_bounds = array<i64: 2, 1>, scalar_prefetch = 0 : i64, scratch_operands = 0 : i64, tpu.core_type = #tpu.core_type<tc>, window_params = [{transform_indices = @transform_0, window_bounds = array<i64: 1, 3, 17, 128>}, {pipeline_mode = #tpu.pipeline_mode<synchronous>, transform_indices = @transform_1, window_bounds = array<i64: 4, 128, 64>}, {pipeline_mode = #tpu.pipeline_mode<synchronous>, transform_indices = @transform_2, window_bounds = array<i64: 1, 64>}, {transform_indices = @transform_3, window_bounds = array<i64: 1, 2, 16, 64>}]} {
    %c2_i32 = arith.constant 2 : i32
    %0 = arith.muli %arg1, %c2_i32 : i32
    %c0 = arith.constant 0 : index
    %1 = arith.index_cast %0 : i32 to index
    %c0_0 = arith.constant 0 : index
    %c0_1 = arith.constant 0 : index
    %2 = vector.load %arg2[%c0, %1, %c0_0, %c0_1] : memref<1x3x17x128xbf16, #tpu.memory_space<vmem>>, vector<1x2x16x128xbf16>
    %3 = vector.shape_cast %2 : vector<1x2x16x128xbf16> to vector<2x16x128xbf16>
    %4 = vector.shape_cast %3 : vector<2x16x128xbf16> to vector<32x128xbf16>
    %c0_2 = arith.constant 0 : index
    %c0_3 = arith.constant 0 : index
    %c0_4 = arith.constant 0 : index
    %5 = vector.load %arg3[%c0_2, %c0_3, %c0_4] : memref<4x128x64xbf16, #tpu.memory_space<vmem>>, vector<1x128x64xbf16>
    %6 = vector.shape_cast %5 : vector<1x128x64xbf16> to vector<128x64xbf16>
    %cst = arith.constant dense<0.000000e+00> : vector<32x64xf32>
    %7 = tpu.matmul %4, %6, %cst {dimension_numbers = #tpu.dot_dimension_numbers<[1], [0], [0], [1], [0, 0, 1, 1], [], []>} : vector<32x128xbf16>, vector<128x64xbf16>, vector<32x64xf32> -> vector<32x64xf32>
    %c2_i32_5 = arith.constant 2 : i32
    %8 = arith.muli %arg1, %c2_i32_5 : i32
    %c0_i32 = arith.constant 0 : i32
    %9 = arith.addi %8, %c0_i32 : i32
    %c0_6 = arith.constant 0 : index
    %10 = arith.index_cast %9 : i32 to index
    %c1 = arith.constant 1 : index
    %c0_7 = arith.constant 0 : index
    %11 = vector.load %arg2[%c0_6, %10, %c1, %c0_7] : memref<1x3x17x128xbf16, #tpu.memory_space<vmem>>, vector<1x2x16x128xbf16>
    %12 = vector.shape_cast %11 : vector<1x2x16x128xbf16> to vector<2x16x128xbf16>
    %13 = vector.shape_cast %12 : vector<2x16x128xbf16> to vector<32x128xbf16>
    %c1_8 = arith.constant 1 : index
    %c0_9 = arith.constant 0 : index
    %c0_10 = arith.constant 0 : index
    %14 = vector.load %arg3[%c1_8, %c0_9, %c0_10] : memref<4x128x64xbf16, #tpu.memory_space<vmem>>, vector<1x128x64xbf16>
    %15 = vector.shape_cast %14 : vector<1x128x64xbf16> to vector<128x64xbf16>
    %cst_11 = arith.constant dense<0.000000e+00> : vector<32x64xf32>
    %16 = tpu.matmul %13, %15, %cst_11 {dimension_numbers = #tpu.dot_dimension_numbers<[1], [0], [0], [1], [0, 0, 1, 1], [], []>} : vector<32x128xbf16>, vector<128x64xbf16>, vector<32x64xf32> -> vector<32x64xf32>
    %17 = arith.addf %7, %16 : vector<32x64xf32>
    %c2_i32_12 = arith.constant 2 : i32
    %18 = arith.muli %arg1, %c2_i32_12 : i32
    %c1_i32 = arith.constant 1 : i32
    %19 = arith.addi %18, %c1_i32 : i32
    %c0_13 = arith.constant 0 : index
    %20 = arith.index_cast %19 : i32 to index
    %c0_14 = arith.constant 0 : index
    %c0_15 = arith.constant 0 : index
    %21 = vector.load %arg2[%c0_13, %20, %c0_14, %c0_15] : memref<1x3x17x128xbf16, #tpu.memory_space<vmem>>, vector<1x2x16x128xbf16>
    %22 = vector.shape_cast %21 : vector<1x2x16x128xbf16> to vector<2x16x128xbf16>
    %23 = vector.shape_cast %22 : vector<2x16x128xbf16> to vector<32x128xbf16>
    %c2 = arith.constant 2 : index
    %c0_16 = arith.constant 0 : index
    %c0_17 = arith.constant 0 : index
    %24 = vector.load %arg3[%c2, %c0_16, %c0_17] : memref<4x128x64xbf16, #tpu.memory_space<vmem>>, vector<1x128x64xbf16>
    %25 = vector.shape_cast %24 : vector<1x128x64xbf16> to vector<128x64xbf16>
    %cst_18 = arith.constant dense<0.000000e+00> : vector<32x64xf32>
    %26 = tpu.matmul %23, %25, %cst_18 {dimension_numbers = #tpu.dot_dimension_numbers<[1], [0], [0], [1], [0, 0, 1, 1], [], []>} : vector<32x128xbf16>, vector<128x64xbf16>, vector<32x64xf32> -> vector<32x64xf32>
    %27 = arith.addf %17, %26 : vector<32x64xf32>
    %c2_i32_19 = arith.constant 2 : i32
    %28 = arith.muli %arg1, %c2_i32_19 : i32
    %c1_i32_20 = arith.constant 1 : i32
    %29 = arith.addi %28, %c1_i32_20 : i32
    %c0_21 = arith.constant 0 : index
    %30 = arith.index_cast %29 : i32 to index
    %c1_22 = arith.constant 1 : index
    %c0_23 = arith.constant 0 : index
    %31 = vector.load %arg2[%c0_21, %30, %c1_22, %c0_23] : memref<1x3x17x128xbf16, #tpu.memory_space<vmem>>, vector<1x2x16x128xbf16>
    %32 = vector.shape_cast %31 : vector<1x2x16x128xbf16> to vector<2x16x128xbf16>
    %33 = vector.shape_cast %32 : vector<2x16x128xbf16> to vector<32x128xbf16>
    %c3 = arith.constant 3 : index
    %c0_24 = arith.constant 0 : index
    %c0_25 = arith.constant 0 : index
    %34 = vector.load %arg3[%c3, %c0_24, %c0_25] : memref<4x128x64xbf16, #tpu.memory_space<vmem>>, vector<1x128x64xbf16>
    %35 = vector.shape_cast %34 : vector<1x128x64xbf16> to vector<128x64xbf16>
    %cst_26 = arith.constant dense<0.000000e+00> : vector<32x64xf32>
    %36 = tpu.matmul %33, %35, %cst_26 {dimension_numbers = #tpu.dot_dimension_numbers<[1], [0], [0], [1], [0, 0, 1, 1], [], []>} : vector<32x128xbf16>, vector<128x64xbf16>, vector<32x64xf32> -> vector<32x64xf32>
    %37 = arith.addf %27, %36 : vector<32x64xf32>
    %c0_27 = arith.constant 0 : index
    %c0_28 = arith.constant 0 : index
    %38 = vector.load %arg4[%c0_27, %c0_28] : memref<1x64xf32, #tpu.memory_space<vmem>>, vector<1x64xf32>
    %39 = vector.broadcast %38 : vector<1x64xf32> to vector<32x64xf32>
    %40 = arith.addf %37, %39 : vector<32x64xf32>
    %cst_29 = arith.constant 0.000000e+00 : f32
    %41 = vector.broadcast %cst_29 : f32 to vector<32x64xf32>
    %42 = arith.maximumf %40, %41 : vector<32x64xf32>
    %43 = vector.shape_cast %42 : vector<32x64xf32> to vector<2x16x64xf32>
    %c0_30 = arith.constant 0 : index
    %c0_31 = arith.constant 0 : index
    %c0_32 = arith.constant 0 : index
    %c0_33 = arith.constant 0 : index
    %44 = vector.load %arg5[%c0_30, %c0_31, %c0_32, %c0_33] : memref<1x2x16x64xf32, #tpu.memory_space<vmem>>, vector<1x2x16x64xf32>
    %45 = vector.shape_cast %44 : vector<1x2x16x64xf32> to vector<2x16x64xf32>
    %46 = vector.shape_cast %43 : vector<2x16x64xf32> to vector<1x2x16x64xf32>
    tpu.vector_store %arg5[%c0_30, %c0_31, %c0_32, %c0_33], %46 {strides = array<i32>} : memref<1x2x16x64xf32, #tpu.memory_space<vmem>>, vector<1x2x16x64xf32>,
    return
  }
  func.func @transform_0(%arg0: i32, %arg1: i32) -> (i32, i32, i32, i32) {
    %c0_i32 = arith.constant 0 : i32
    %c0_i32_0 = arith.constant 0 : i32
    %c0_i32_1 = arith.constant 0 : i32
    %c0_i32_2 = arith.constant 0 : i32
    return %arg0, %c0_i32, %c0_i32_0, %c0_i32_1 : i32, i32, i32, i32
  }
  func.func @transform_1(%arg0: i32, %arg1: i32) -> (i32, i32, i32) {
    %c0_i32 = arith.constant 0 : i32
    %c0_i32_0 = arith.constant 0 : i32
    %c0_i32_1 = arith.constant 0 : i32
    %c0_i32_2 = arith.constant 0 : i32
    return %c0_i32, %c0_i32_0, %c0_i32_1 : i32, i32, i32
  }
  func.func @transform_2(%arg0: i32, %arg1: i32) -> (i32, i32) {
    %c0_i32 = arith.constant 0 : i32
    %c0_i32_0 = arith.constant 0 : i32
    %c0_i32_1 = arith.constant 0 : i32
    return %c0_i32, %c0_i32_0 : i32, i32
  }
  func.func @transform_3(%arg0: i32, %arg1: i32) -> (i32, i32, i32, i32) {
    %c0_i32 = arith.constant 0 : i32
    %c0_i32_0 = arith.constant 0 : i32
    %c0_i32_1 = arith.constant 0 : i32
    return %arg0, %arg1, %c0_i32, %c0_i32_0 : i32, i32, i32, i32
  }
}

</mosaic_0001>

<bundles_post_ra>
// kernel: _forward.3
= control target key start
LH: loop header
LB: loop body
LE: loop exit
PB: predicated region body
PF: predicated region fallthrough
CT: control target
= control target key end

     0   :  { %s1068_s12 = smov 0   ;;  %s1070_s13 = smov 0   ;;  %s1274_s0 = inlined_call_operand.vmem [shape: bf16[2,9,17,12], index: 0, kind: input, shape index: {}]   ;;  %s1275_s1 = inlined_call_operand.vmem [shape: bf16[4,12,16], index: 1, kind: input, shape index: {}]   ;;  %s1276_s2 = inlined_call_operand.vmem [shape: f32[1,16], index: 2, kind: input, shape index: {}]   ;;  %s1277_s3 = inlined_call_operand.vmem [shape: f32[2,8,16,16], index: 3, kind: output, shape index: {}]  }
   0x1   :  { %s1072_s14 = smov 0   ;;  %s1074_s15 = smov 0  }
   0x2   :  { %s1076_s16 = smov 0  }
   0x3 LB: > { %s22_s17 = sadd.s32 1, %s1038_s14  ;;  %s25_s18 = sadd.s32 1, %s1042_s15  ;;  %s1046_s16 = sphi %s1076_s16, %s13_s16   ;;  %s1042_s15 = sphi %s1074_s15, %s1283_s15   ;;  %s1038_s14 = sphi %s1072_s14, %s1282_s14   ;;  %s1034_s13 = sphi %s1070_s13, %s1281_s13   ;;  %s1030_s12 = sphi %s1068_s12, %s1280_s12  }
   0x4   : > { %p23_p0 = scmp.ge.s32.totalorder %s22_s17, 2  ;;  %p850_p1 = scmp.ge.s32.totalorder %s1046_s16, 1 }
   0x5   : > { %p151_p2 = scmp.lt.s32.totalorder %s1046_s16, 5 }
   0x6   : > { %s1285_s17 = smov (%p23_p0, %s22_s17), 0  ;;  %s1287_s18 = smov (!%p23_p0, %s25_s18), %s1042_s15 }
   0x7   : > { %p152_p3 = pnand %p850_p1, %p151_p2  ;;  %p27_p4 = scmp.ge.s32.totalorder %s1287_s18, 2 }
   0x8   : > { %p180_p5 = scmp.lt.s32.totalorder (!%p152_p3), %s1034_s13, 1  ;;  %s953_s4 = smul.u32 (!%p152_p3), 48, %s1030_s12 }
   0x9   : > { %s1289_s18 = smov (%p27_p4, %s1287_s18), 0  ;;  %155 = sbr.rel (%p152_p3) target bundleno = 234 (0xea), region = 32 }
   0xa   : > { %s852_s21 = sshll.u32 (!%p152_p3), %s1030_s12, 2 }
   0xb   : > { %p188_p6 = scmp.lt.s32.totalorder (!%p152_p3), %s852_s21, 7 }
   0xe   : > { %vm347_vm0 = vcmask 1045504   ;;  %v923_v0 = vld [vmem:[%s1275_s1 + $0x10] sm:$0xf]  ;;  %v964_v1 = vld [vmem:[%s1275_s1 + $0x10] sm:$0x30]  ;;  %s1291_s13 = smov (!%p180_p5, %s1034_s13), 1 }
   0xf   : > { %v924_v2 = vor.u32 %v964_v1, %v923_v0  ;;  %v887_v3 = vld [vmem:[%s1275_s1] sm:$0xf]  ;;  %v958_v4 = vld [vmem:[%s1275_s1] sm:$0x30]  ;;  %v863_v6 = vld [vmem:[%s1275_s1 + $0x8] sm:$0xf] }
  0x10   : > { %v888_v5 = vor.u32 %v958_v4, %v887_v3  ;;  %v959_v7 = vld [vmem:[%s1275_s1 + $0x8] sm:$0x30]  ;;  %v945_v10 = vld [vmem:[%s1275_s1 + $0x18] sm:$0xf]  ;;  %v965_v11 = vld [vmem:[%s1275_s1 + $0x18] sm:$0x30] }
  0x11   : > { %v502_v8 = vsel %vm347_vm0, %v924_v2, 0  ;;  %v864_v9 = vor.u32 %v959_v7, %v863_v6  ;;  %s966_s9 = smul.u32 108, %s1291_s13  ;;  %v946_v13 = vor.u32 %v965_v11, %v945_v10  ;;  %vm334_vm1 = vcmask 97280   ;;  %s1293_s21 = smov (!%p188_p6, %s852_s21), 7 }
  0x12   : > { %511 = vmatpush.bf16.msra.mxu2 %v502_v8  ;;  %v418_v12 = vsel %vm347_vm0, %v888_v5, 0  ;;  %vm215_vm2 = vsmask.f32 3328  ;;  %vm216_vm3 = vsmask.f32 7440  ;;  %s853_s22 = sshll.u32 %s1293_s21, 1 }
  0x13   : > { %427 = vmatpush.bf16.msra.mxu1 %v418_v12  ;;  %v349_v14 = vsel %vm347_vm0, %v864_v9, 0  ;;  %s184_s19 = scalar_lea.vmem %s1274_s0, %s966_s9  ;;  %v682_v15 = vsel %vm347_vm0, %v946_v13, 0  ;;  %vm1150_vm4 = vmor %vm215_vm2, %vm216_vm3  ;;  %s854_s23 = sshll.u32 %s1291_s13, 4  ;;  %vm741_vm5 = vcmask 130048  }
  0x14   : > { %358 = vmatpush.bf16.msra.mxu0 %v349_v14  ;;  %s1135_s20 = scalar_lea.vmem %s184_s19, %s953_s4  ;;  %691 = vmatpush.bf16.msra.mxu3 %v682_v15  ;;  %s192_s24 = sadd.s32 %s854_s23, %s853_s22 }
  0x15   : > { %v960_v16 = vld [vmem:[%s1135_s20 + $0xc] sm:$0xff]  ;;  %v954_v17 = vld [vmem:[%s1135_s20] sm:$0xff]  ;;  %v211_v20 = vld [vmem:[%s1135_s20 + $0x8] sm:$0x1]  ;;  %s855_s27 = sshll.u32 %s192_s24, 3 }
  0x16   : > { %v201_v18 = vld [vmem:[%s1135_s20] sm:$0xf]  ;;  %v202_v19 = vld [vmem:[%s1135_s20 + $0x4] sm:$0xf]  ;;  %925 = vmatmul.msk.bf16.vlgmr.msra.gmra.mxu2 %vm334_vm1, %v960_v16  ;;  %889 = vmatmul.msk.bf16.vlgmr.msra.gmra.mxu1 %vm334_vm1, %v954_v17  ;;  %v238_v25 = vshll.u32 %v211_v20, 16  ;;  %v961_v14 = vld [vmem:[%s1135_s20 + $0x18] sm:$0xff]  ;;  %s1234_s29 = scalar_lea.vmem %s1277_s3, %s855_s27 }
  0x17   : > { %v219_v21 = vshrl.u32 %v201_v18, 16  ;;  %v222_v22 = vshll.u32 %v201_v18, 16  ;;  %v228_v23 = vshll.u32 %v202_v19, 16  ;;  %v232_v24 = vshrl.u32 %v202_v19, 16  ;;  %v929_v26 = vld [vmem:[%s1135_s20 + $0xc] sm:$0xf] }
  0x18   : > { %v930_v29 = vld [vmem:[%s1135_s20 + $0x10] sm:$0xf]  ;;  %v931_v30 = vld [vmem:[%s1135_s20 + $0x14] sm:$0x1]  ;;  %v554_v33 = vshrl.u32 %v929_v26, 16  ;;  %v557_v35 = vshll.u32 %v929_v26, 16 }
  0x19   : > { %v221_v27 = vrot.slane %v219_v21, 4  ;;  %v224_v28 = vrot.slane %v222_v22, 5  ;;  %v230_v31 = vrot.slane %v228_v23, 5  ;;  %v234_v32 = vrot.slane %v232_v24, 4  ;;  %v203_v38 = vld [vmem:[%s1135_s20 + $0xc] sm:$0xf] }
  0x1a   : > { %v563_v36 = vshll.u32 %v930_v29, 16  ;;  %v567_v37 = vshrl.u32 %v930_v29, 16  ;;  %v240_v41 = vrot.slane %v238_v25, 5  ;;  %v556_v42 = vrot.slane %v554_v33, 4  ;;  %v204_v44 = vld [vmem:[%s1135_s20 + $0x10] sm:$0xf] }
  0x1b   : > { %v225_v34 = vor.u32 %v224_v28, %v221_v27  ;;  %v235_v40 = vor.u32 %v234_v32, %v230_v31  ;;  %v573_v43 = vshll.u32 %v931_v30, 16  ;;  %v559_v46 = vrot.slane %v557_v35, 5  ;;  %v212_v56 = vld [vmem:[%s1135_s20 + $0x14] sm:$0x1]  ;;  %v932_v58 = vld [vmem:[%s1135_s20 + $0x18] sm:$0xf] }
  0x1c   : > { %v565_v47 = vrot.slane %v563_v36, 5  ;;  %v569_v48 = vrot.slane %v567_v37, 4  ;;  %v243_v51 = vshrl.u32 %v203_v38, 16  ;;  %v246_v52 = vshll.u32 %v203_v38, 16  ;;  %v933_v6 = vld [vmem:[%s1135_s20 + $0x1c] sm:$0xf] }
  0x1d   : > { %v226_v45 = vrot.slane %v225_v34, 4  ;;  %v236_v49 = vrot.slane %v235_v40, 4  ;;  %v575_v50 = vrot.slane %v573_v43, 5  ;;  %v560_v54 = vor.u32 %v559_v46, %v556_v42  ;;  %v955_v15 = vld [vmem:[%s1135_s20 + $0xc] sm:$0xff]  ;;  %v934_v17 = vld [vmem:[%s1135_s20 + $0x20] sm:$0x1] }
  0x1e   : > { %v570_v55 = vor.u32 %v569_v48, %v565_v47  ;;  %v252_v57 = vshll.u32 %v204_v44, 16  ;;  %v245_v61 = vrot.slane %v243_v51, 4  ;;  %v248_v62 = vrot.slane %v246_v52, 5  ;;  %v205_v22 = vld [vmem:[%s1135_s20 + $0x18] sm:$0xf] }
  0x1f   : > { %v231_v53 = vsel %vm1150_vm4, %v226_v45, %v230_v31  ;;  %v241_v59 = vsel %vm1150_vm4, %v236_v49, %v240_v41  ;;  %v561_v0 = vrot.slane %v560_v54, 4  ;;  %v256_v4 = vshrl.u32 %v204_v44, 16  ;;  %v206_v27 = vld [vmem:[%s1135_s20 + $0x1c] sm:$0xf]  ;;  %v935_v43 = vld [vmem:[%s1135_s20 + $0x24] sm:$0xf] }
  0x20   : > { %v317_v60 = vunpack.c.l.b16 %v231_v53  ;;  %v318_v63 = vunpack.c.l.b16 %v241_v59  ;;  %v571_v1 = vrot.slane %v570_v55, 4  ;;  %v254_v2 = vrot.slane %v252_v57, 5  ;;  %v936_v46 = vld [vmem:[%s1135_s20 + $0x28] sm:$0xf] }
  0x21   : > { %v249_v3 = vor.u32 %v248_v62, %v245_v61  ;;  %v262_v5 = vshll.u32 %v212_v56, 16  ;;  %v578_v7 = vshrl.u32 %v932_v58, 16  ;;  %v566_v9 = vsel %vm1150_vm4, %v561_v0, %v565_v47  ;;  %v213_v56 = vld [vmem:[%s1135_s20 + $0x20] sm:$0x1] }
  0x22   : > { %v325_v8 = vpack.c.b16 %v318_v63, %v317_v60  ;;  %v576_v10 = vsel %vm1150_vm4, %v571_v1, %v575_v50  ;;  %v581_v11 = vshll.u32 %v932_v58, 16  ;;  %v652_v12 = vunpack.c.l.b16 %v566_v9 }
  0x23   : > { %v653_v13 = vunpack.c.l.b16 %v576_v10  ;;  %v258_v16 = vrot.slane %v256_v4, 4  ;;  %v250_v18 = vrot.slane %v249_v3, 4  ;;  %v580_v19 = vrot.slane %v578_v7, 4  ;;  %v937_v4 = vld [vmem:[%s1135_s20 + $0x2c] sm:$0x1]  ;;  %v962_v7 = vld [vmem:[%s1135_s20 + $0x24] sm:$0xff] }
  0x24   : > { %865 = vmatmul.msk.bf16.vlgmr.msra.gmra.mxu0 %vm334_vm1, %v325_v8  ;;  %v583_v20 = vrot.slane %v581_v11, 5  ;;  %v587_v21 = vshll.u32 %v933_v6, 16  ;;  %v264_v25 = vrot.slane %v262_v5, 5  ;;  %v591_v26 = vshrl.u32 %v933_v6, 16  ;;  %v956_v10 = vld [vmem:[%s1135_s20 + $0x18] sm:$0xff] }
  0x25   : > { %v660_v23 = vpack.c.b16 %v653_v13, %v652_v12  ;;  %v259_v24 = vor.u32 %v258_v16, %v254_v2  ;;  %v597_v30 = vshll.u32 %v934_v17, 16  ;;  %v267_v33 = vshrl.u32 %v205_v22, 16  ;;  %v208_v16 = vld [vmem:[%s1135_s20 + $0x28] sm:$0xf] }
  0x26   : > { %v584_v28 = vor.u32 %v583_v20, %v580_v19  ;;  %v589_v29 = vrot.slane %v587_v21, 5  ;;  %926 = vmatmul.msk.bf16.gmra.mxu2 %vm334_vm1, %v961_v14  ;;  %v593_v32 = vrot.slane %v591_v26, 4  ;;  %v270_v34 = vshll.u32 %v205_v22, 16  ;;  %890 = vmatmul.msk.bf16.gmra.mxu1 %vm334_vm1, %v955_v15  ;;  %v207_v15 = vld [vmem:[%s1135_s20 + $0x24] sm:$0xf] }
  0x27   : > { %947 = vmatmul.msk.bf16.vlgmr.msra.gmra.mxu3 %vm334_vm1, %v660_v23  ;;  %v260_v31 = vrot.slane %v259_v24, 4  ;;  %v255_v35 = vsel %vm1150_vm4, %v250_v18, %v254_v2  ;;  %v276_v37 = vshll.u32 %v206_v27, 16  ;;  %v280_v38 = vshrl.u32 %v206_v27, 16  ;;  %v938_v22 = vld [vmem:[%s1135_s20 + $0x30] sm:$0xf] }
  0x28   : > { %v585_v36 = vrot.slane %v584_v28, 4  ;;  %v594_v41 = vor.u32 %v593_v32, %v589_v29  ;;  %v599_v42 = vrot.slane %v597_v30, 5  ;;  %v269_v44 = vrot.slane %v267_v33, 4  ;;  %v939_v27 = vld [vmem:[%s1135_s20 + $0x34] sm:$0xf] }
  0x29   : > { %v265_v40 = vsel %vm1150_vm4, %v260_v31, %v264_v25  ;;  %v272_v45 = vrot.slane %v270_v34, 5  ;;  %v319_v47 = vunpack.c.l.b16 %v255_v35  ;;  %v278_v51 = vrot.slane %v276_v37, 5 }
  0x2a   : > { %v320_v48 = vunpack.c.l.b16 %v265_v40  ;;  %v590_v49 = vsel %vm1150_vm4, %v585_v36, %v589_v29  ;;  %v595_v50 = vrot.slane %v594_v41, 4  ;;  %v282_v52 = vrot.slane %v280_v38, 4  ;;  %v214_v41 = vld [vmem:[%s1135_s20 + $0x2c] sm:$0x1] }
  0x2b   : > { %v602_v53 = vshrl.u32 %v935_v43, 16  ;;  %v605_v54 = vshll.u32 %v935_v43, 16  ;;  %v611_v57 = vshll.u32 %v936_v46, 16  ;;  %v654_v58 = vunpack.c.l.b16 %v590_v49 }
  0x2c   : > { %v600_v55 = vsel %vm1150_vm4, %v595_v50, %v599_v42  ;;  %v273_v59 = vor.u32 %v272_v45, %v269_v44  ;;  %v615_v63 = vshrl.u32 %v936_v46, 16  ;;  %v326_v0 = vpack.c.b16 %v320_v48, %v319_v47 }
  0x2d   : > { %v655_v60 = vunpack.c.l.b16 %v600_v55  ;;  %v604_v61 = vrot.slane %v602_v53, 4  ;;  %v607_v62 = vrot.slane %v605_v54, 5  ;;  %v283_v1 = vor.u32 %v282_v52, %v278_v51  ;;  %v940_v52 = vld [vmem:[%s1135_s20 + $0x38] sm:$0x1]  ;;  %v963_v54 = vld [vmem:[%s1135_s20 + $0x30] sm:$0xff]  ;;  %v957_v55 = vld [vmem:[%s1135_s20 + $0x24] sm:$0xff] }
  0x2e   : > { %v286_v2 = vshll.u32 %v213_v56, 16  ;;  %v613_v3 = vrot.slane %v611_v57, 5  ;;  %v617_v5 = vrot.slane %v615_v63, 4  ;;  %v274_v8 = vrot.slane %v273_v59, 4 }
  0x2f   : > { %v661_v6 = vpack.c.b16 %v655_v60, %v654_v58  ;;  %v608_v9 = vor.u32 %v607_v62, %v604_v61  ;;  %v284_v11 = vrot.slane %v283_v1, 4  ;;  %v621_v14 = vshll.u32 %v937_v4, 16 }
  0x30   : > { %v288_v12 = vrot.slane %v286_v2, 5  ;;  %v618_v13 = vor.u32 %v617_v5, %v613_v3  ;;  %v279_v18 = vsel %vm1150_vm4, %v274_v8, %v278_v51  ;;  %v291_v23 = vshrl.u32 %v207_v15, 16 }
  0x31   : > { %v609_v17 = vrot.slane %v608_v9, 4  ;;  %v623_v21 = vrot.slane %v621_v14, 5  ;;  %v294_v24 = vshll.u32 %v207_v15, 16  ;;  %v300_v25 = vshll.u32 %v208_v16, 16 }
  0x32   : > { %v289_v19 = vsel %vm1150_vm4, %v284_v11, %v288_v12  ;;  %v619_v20 = vrot.slane %v618_v13, 4  ;;  %v304_v26 = vshrl.u32 %v208_v16, 16  ;;  %v321_v28 = vunpack.c.l.b16 %v279_v18 }
  0x33   : > { %v322_v29 = vunpack.c.l.b16 %v289_v19  ;;  %v614_v30 = vsel %vm1150_vm4, %v609_v17, %v613_v3  ;;  %v626_v31 = vshrl.u32 %v938_v22, 16  ;;  %v629_v33 = vshll.u32 %v938_v22, 16  ;;  %v1228_v17 = vld [vmem:[%s1276_s2] ss:$0 sm:$0xff] }
  0x34   : > { %866 = vmatmul.msk.bf16.gmra.mxu0 %vm334_vm1, %v326_v0  ;;  %v624_v32 = vsel %vm1150_vm4, %v619_v20, %v623_v21  ;;  %v635_v34 = vshll.u32 %v939_v27, 16  ;;  %v639_v35 = vshrl.u32 %v939_v27, 16  ;;  %v293_v36 = vrot.slane %v291_v23, 4 }
  0x35   : > { %v296_v37 = vrot.slane %v294_v24, 5  ;;  %v302_v38 = vrot.slane %v300_v25, 5  ;;  %v306_v40 = vrot.slane %v304_v26, 4  ;;  %v327_v42 = vpack.c.b16 %v322_v29, %v321_v28 }
  0x36   : > { %927 = vmatmul.msk.bf16.gmra.mxu2 %vm334_vm1, %v962_v7  ;;  %891 = vmatmul.msk.bf16.gmra.mxu1 %vm334_vm1, %v956_v10  ;;  %v656_v43 = vunpack.c.l.b16 %v614_v30  ;;  %v657_v44 = vunpack.c.l.b16 %v624_v32  ;;  %v628_v45 = vrot.slane %v626_v31, 4  ;;  %v631_v46 = vrot.slane %v629_v33, 5 }
  0x37   : > { %948 = vmatmul.msk.bf16.gmra.mxu3 %vm334_vm1, %v661_v6  ;;  %v637_v47 = vrot.slane %v635_v34, 5  ;;  %v641_v48 = vrot.slane %v639_v35, 4  ;;  %v297_v49 = vor.u32 %v296_v37, %v293_v36  ;;  %v307_v50 = vor.u32 %v306_v40, %v302_v38 }
  0x38   : > { %v310_v51 = vshll.u32 %v214_v41, 16  ;;  %v662_v53 = vpack.c.b16 %v657_v44, %v656_v43  ;;  %v632_v56 = vor.u32 %v631_v46, %v628_v45  ;;  %v645_v58 = vshll.u32 %v940_v52, 16 }
  0x39   : > { %v642_v57 = vor.u32 %v641_v48, %v637_v47  ;;  %v298_v59 = vrot.slane %v297_v49, 4  ;;  %v308_v60 = vrot.slane %v307_v50, 4 }
  0x3a   : > { %v312_v61 = vrot.slane %v310_v51, 5  ;;  %v633_v62 = vrot.slane %v632_v56, 4  ;;  %v647_v0 = vrot.slane %v645_v58, 5 }
  0x3b   : > { %v643_v63 = vrot.slane %v642_v57, 4  ;;  %v303_v1 = vsel %vm1150_vm4, %v298_v59, %v302_v38 }
  0x3c   : > { %v313_v2 = vsel %vm1150_vm4, %v308_v60, %v312_v61  ;;  %v323_v3 = vunpack.c.l.b16 %v303_v1  ;;  %v638_v5 = vsel %vm1150_vm4, %v633_v62, %v637_v47 }
  0x3d   : > { %v324_v4 = vunpack.c.l.b16 %v313_v2  ;;  %v648_v6 = vsel %vm1150_vm4, %v643_v63, %v647_v0  ;;  %v658_v7 = vunpack.c.l.b16 %v638_v5 }
  0x3e   : > { %v659_v8 = vunpack.c.l.b16 %v648_v6 }
  0x3f   : > { %v328_v9 = vpack.c.b16 %v324_v4, %v323_v3 }
  0x40   : > { %v663_v10 = vpack.c.b16 %v659_v8, %v658_v7 }
  0x44   : > { %867 = vmatmul.msk.bf16.gmra.mxu0 %vm334_vm1, %v327_v42 }
  0x46   : > { %928 = vmatmul.msk.bf16.gmra.mxu2 %vm334_vm1, %v963_v54  ;;  %892 = vmatmul.msk.bf16.gmra.mxu1 %vm334_vm1, %v957_v55 }
  0x47   : > { %949 = vmatmul.msk.bf16.gmra.mxu3 %vm334_vm1, %v662_v53 }
  0x54   : > { %868 = vmatmul.msk.bf16.gmra.mxu0 %vm334_vm1, %v328_v9 }
  0x57   : > { %950 = vmatmul.msk.bf16.gmra.mxu3 %vm334_vm1, %v663_v10 }
  0x93   : > { %v429_v11 = vpop.f32.mrf.mxu1 }
  0x99   : > { %v513_v12 = vpop.f32.mrf.mxu2 }
  0x9b   : > { %v431_v13 = vpop.f32.mrf.mxu1 }
  0xa1   : > { %v360_v14 = vpop.f32.mrf.mxu0  ;;  %v515_v16 = vpop.f32.mrf.mxu2 }
  0xa2   : > { %v430_v15 = vadd.f32 %v429_v11, %v360_v14 }
  0xa3   : > { %v434_v20 = vpop.f32.mrf.mxu1 }
  0xa4   : > { %v533_v39 = vadd.f32 %v513_v12, %v430_v15 }
  0xa9   : > { %v362_v18 = vpop.f32.mrf.mxu0  ;;  %v518_v24 = vpop.f32.mrf.mxu2 }
  0xaa   : > { %v693_v19 = vpop.f32.mrf.mxu3  ;;  %v432_v23 = vadd.f32 %v431_v13, %v362_v18 }
  0xab   : > { %v713_v21 = vadd.f32 %v693_v19, %v533_v39  ;;  %v436_v31 = vpop.f32.mrf.mxu1 }
  0xac   : > { %v534_v26 = vadd.f32 %v515_v16, %v432_v23 }
  0xad   : > { %v725_v22 = vadd.f32 %v1228_v17, %v713_v21 }
  0xaf   : > { %v733_v25 = vmax.f32 %v725_v22, 0.0 }
  0xb1   : > { %742 = vst.msk [vmem:[%s1234_s29] sm:$0xff] %vm741_vm5, %v733_v25  ;;  %v365_v27 = vpop.f32.mrf.mxu0  ;;  %v520_v35 = vpop.f32.mrf.mxu2 }
  0xb2   : > { %v695_v28 = vpop.f32.mrf.mxu3  ;;  %v435_v30 = vadd.f32 %v434_v20, %v365_v27 }
  0xb3   : > { %v714_v29 = vadd.f32 %v695_v28, %v534_v26  ;;  %v439_v42 = vpop.f32.mrf.mxu1 }
  0xb4   : > { %v535_v34 = vadd.f32 %v518_v24, %v435_v30 }
  0xb5   : > { %v726_v32 = vadd.f32 %v1228_v17, %v714_v29 }
  0xb7   : > { %v734_v33 = vmax.f32 %v726_v32, 0.0 }
  0xb9   : > { %743 = vst.msk [vmem:[%s1234_s29 + $0x8] sm:$0xff] %vm741_vm5, %v734_v33  ;;  %v367_v36 = vpop.f32.mrf.mxu0  ;;  %v523_v46 = vpop.f32.mrf.mxu2 }
  0xba   : > { %v698_v37 = vpop.f32.mrf.mxu3  ;;  %v437_v41 = vadd.f32 %v436_v31, %v367_v36 }
  0xbb   : > { %v715_v38 = vadd.f32 %v698_v37, %v535_v34  ;;  %v441_v53 = vpop.f32.mrf.mxu1 }
  0xbc   : > { %v536_v44 = vadd.f32 %v520_v35, %v437_v41 }
  0xbd   : > { %v727_v40 = vadd.f32 %v1228_v17, %v715_v38 }
  0xbf   : > { %v735_v43 = vmax.f32 %v727_v40, 0.0 }
  0xc1   : > { %744 = vst.msk [vmem:[%s1234_s29 + $0x10] sm:$0xff] %vm741_vm5, %v735_v43  ;;  %v370_v45 = vpop.f32.mrf.mxu0  ;;  %v525_v57 = vpop.f32.mrf.mxu2 }
  0xc2   : > { %v700_v47 = vpop.f32.mrf.mxu3  ;;  %v440_v49 = vadd.f32 %v439_v42, %v370_v45 }
  0xc3   : > { %v716_v48 = vadd.f32 %v700_v47, %v536_v44  ;;  %v444_v63 = vpop.f32.mrf.mxu1 }
  0xc4   : > { %v537_v52 = vadd.f32 %v523_v46, %v440_v49 }
  0xc5   : > { %v728_v50 = vadd.f32 %v1228_v17, %v716_v48 }
  0xc7   : > { %v736_v51 = vmax.f32 %v728_v50, 0.0 }
  0xc9   : > { %745 = vst.msk [vmem:[%s1234_s29 + $0x18] sm:$0xff] %vm741_vm5, %v736_v51  ;;  %v372_v54 = vpop.f32.mrf.mxu0  ;;  %v528_v4 = vpop.f32.mrf.mxu2 }
  0xca   : > { %v703_v55 = vpop.f32.mrf.mxu3  ;;  %v442_v59 = vadd.f32 %v441_v53, %v372_v54 }
  0xcb   : > { %v717_v56 = vadd.f32 %v703_v55, %v537_v52  ;;  %v446_v10 = vpop.f32.mrf.mxu1 }
  0xcc   : > { %v538_v61 = vadd.f32 %v525_v57, %v442_v59 }
  0xcd   : > { %v729_v58 = vadd.f32 %v1228_v17, %v717_v56 }
  0xcf   : > { %v737_v60 = vmax.f32 %v729_v58, 0.0 }
  0xd1   : > { %746 = vst.msk [vmem:[%s1234_s29 + $0x20] sm:$0xff] %vm741_vm5, %v737_v60  ;;  %v375_v62 = vpop.f32.mrf.mxu0  ;;  %v530_v14 = vpop.f32.mrf.mxu2 }
  0xd2   : > { %v705_v0 = vpop.f32.mrf.mxu3  ;;  %v445_v2 = vadd.f32 %v444_v63, %v375_v62 }
  0xd3   : > { %v718_v1 = vadd.f32 %v705_v0, %v538_v61 }
  0xd4   : > { %v539_v6 = vadd.f32 %v528_v4, %v445_v2 }
  0xd5   : > { %v730_v3 = vadd.f32 %v1228_v17, %v718_v1 }
  0xd7   : > { %v738_v5 = vmax.f32 %v730_v3, 0.0 }
  0xd9   : > { %747 = vst.msk [vmem:[%s1234_s29 + $0x28] sm:$0xff] %vm741_vm5, %v738_v5  ;;  %v377_v8 = vpop.f32.mrf.mxu0 }
  0xda   : > { %v708_v7 = vpop.f32.mrf.mxu3  ;;  %v447_v12 = vadd.f32 %v446_v10, %v377_v8 }
  0xdb   : > { %v719_v9 = vadd.f32 %v708_v7, %v539_v6 }
  0xdc   : > { %v540_v15 = vadd.f32 %v530_v14, %v447_v12 }
  0xdd   : > { %v731_v11 = vadd.f32 %v1228_v17, %v719_v9 }
  0xdf   : > { %v739_v13 = vmax.f32 %v731_v11, 0.0 }
  0xe1   : > { %748 = vst.msk [vmem:[%s1234_s29 + $0x30] sm:$0xff] %vm741_vm5, %v739_v13 }
  0xe2   : > { %v710_v16 = vpop.f32.mrf.mxu3 }
  0xe3   : > { %v720_v39 = vadd.f32 %v710_v16, %v540_v15 }
  0xe5   : > { %v732_v18 = vadd.f32 %v1228_v17, %v720_v39 }
  0xe7   : > { %v740_v19 = vmax.f32 %v732_v18, 0.0 }
  0xe9   : > { %749 = vst.msk [vmem:[%s1234_s29 + $0x38] sm:$0xff] %vm741_vm5, %v740_v19 }
  0xea PF: > { %s13_s16 = sadd.s32 1, %s1046_s16   ;;  %s1280_s12 = smov %s1038_s14 }
  0xeb   : > { %p10_p7 = scmp.ge.s32.totalorder %s13_s16, 6   ;;  %s1281_s13 = smov %s1042_s15 }
  0xec   : > { %s1282_s14 = smov %s1285_s17  ;;  %s1283_s15 = smov %s1289_s18 }
  0xed   :  { %12 = sbr.rel (!%p10_p7) target bundleno = 3 (0x3), region = 67 }

// kernel: _forward.4
= control target key start
LH: loop header
LB: loop body
LE: loop exit
PB: predicated region body
PF: predicated region fallthrough
CT: control target
= control target key end

     0   :  { %s1191_s12 = smov 0   ;;  %s1193_s13 = smov 0   ;;  %s1395_s0 = inlined_call_operand.vmem [shape: bf16[2,5,17,64], index: 0, kind: input, shape index: {}]   ;;  %s1396_s1 = inlined_call_operand.vmem [shape: bf16[4,64,32], index: 1, kind: input, shape index: {}]   ;;  %s1397_s2 = inlined_call_operand.vmem [shape: f32[1,32], index: 2, kind: input, shape index: {}]   ;;  %s1398_s3 = inlined_call_operand.vmem [shape: f32[2,4,16,32], index: 3, kind: output, shape index: {}]  }
   0x1   :  { %s1195_s14 = smov 0  }
   0x2 LB: > { %s25_s15 = sadd.s32 1, %s1165_s13  ;;  %p934_p0 = scmp.ge.s32.totalorder %s1169_s14, 1  ;;  %s1169_s14 = sphi %s1195_s14, %s13_s14   ;;  %s1165_s13 = sphi %s1193_s13, %s1402_s13   ;;  %s1161_s12 = sphi %s1191_s12, %s1401_s12  }
   0x3   : > { %p27_p1 = scmp.ge.s32.totalorder %s25_s15, 2  ;;  %p151_p2 = scmp.lt.s32.totalorder %s1169_s14, 3 }
   0x5   : > { %s1404_s15 = smov (%p27_p1, %s25_s15), 0  ;;  %p152_p3 = pnand %p934_p0, %p151_p2 }
   0x6   : > { %p180_p4 = scmp.lt.s32.totalorder (!%p152_p3), %s1161_s12, 1 }
   0x7   : > { %155 = sbr.rel (%p152_p3) target bundleno = 229 (0xe5), region = 32 }
   0xc   : > { %v1104_v0 = vld [vmem:[%s1396_s1 + $0x18] sm:$0xff]  ;;  %v1103_v4 = vld [vmem:[%s1396_s1 + $0x10] sm:$0xff]  ;;  %s1406_s12 = smov (!%p180_p4, %s1161_s12), 1  ;;  %v1102_v8 = vld [vmem:[%s1396_s1 + $0x8] sm:$0xff]  ;;  %vm221_vm0 = vsmask.f32 3328 }
   0xd   : > { %v1116_v1 = vld [vmem:[%s1396_s1 + $0x58] sm:$0xff]  ;;  %467 = vmatpush.bf16.msra.mxu1 %v1104_v0  ;;  %v1115_v5 = vld [vmem:[%s1396_s1 + $0x50] sm:$0xff]  ;;  %s1121_s5 = smul.u32 60, %s1406_s12  ;;  %v1114_v9 = vld [vmem:[%s1396_s1 + $0x48] sm:$0xff]  ;;  %vm222_vm1 = vsmask.f32 7440 }
   0xe   : > { %v1108_v2 = vld [vmem:[%s1396_s1 + $0x38] sm:$0xff]  ;;  %573 = vmatpush.bf16.msra.mxu2 %v1116_v1  ;;  %v1107_v6 = vld [vmem:[%s1396_s1 + $0x30] sm:$0xff]  ;;  %v1106_v10 = vld [vmem:[%s1396_s1 + $0x28] sm:$0xff]  ;;  %vm365_vm2 = vcmask 523264   ;;  %s1096_s4 = sshll.u32 %s1406_s12, 6  ;;  %vm828_vm4 = vcmask 261120  }
   0xf   : > { %v1120_v3 = vld [vmem:[%s1396_s1 + $0x78] sm:$0xff]  ;;  %382 = vmatpush.bf16.msra.mxu0 %v1108_v2  ;;  %v1119_v7 = vld [vmem:[%s1396_s1 + $0x70] sm:$0xff]  ;;  %s1245_s16 = scalar_lea.vmem %s1395_s0, %s1121_s5  ;;  %v1118_v11 = vld [vmem:[%s1396_s1 + $0x68] sm:$0xff]  ;;  %s1361_s7 = scalar_lea.vmem %s1398_s3, %s1096_s4 }
  0x10   : > { %775 = vmatpush.bf16.msra.mxu3 %v1120_v3  ;;  %v201_v12 = vld [vmem:[%s1245_s16] sm:$0xf]  ;;  %v202_v14 = vld [vmem:[%s1245_s16 + $0x4] sm:$0xf]  ;;  %v217_v15 = vld [vmem:[%s1245_s16 + $0x8] sm:$0x1] }
  0x11   : > { %468 = vmatpush.bf16.msra.mxu1 %v1103_v4  ;;  %v1101_v13 = vld [vmem:[%s1396_s1] sm:$0xff]  ;;  %v225_v16 = vshrl.u32 %v201_v12, 16  ;;  %v228_v17 = vshll.u32 %v201_v12, 16  ;;  %v234_v19 = vshll.u32 %v202_v14, 16  ;;  %v238_v20 = vshrl.u32 %v202_v14, 16  ;;  %v1109_v38 = vld [vmem:[%s1245_s16 + $0xc] sm:$0xff]  ;;  %vm1276_vm3 = vmor %vm221_vm0, %vm222_vm1 }
  0x12   : > { %574 = vmatpush.bf16.msra.mxu2 %v1115_v5  ;;  %v1113_v18 = vld [vmem:[%s1396_s1 + $0x40] sm:$0xff]  ;;  %v244_v21 = vshll.u32 %v217_v15, 16  ;;  %v1054_v22 = vld [vmem:[%s1245_s16 + $0xc] sm:$0xf]  ;;  %v1055_v25 = vld [vmem:[%s1245_s16 + $0x10] sm:$0xf] }
  0x13   : > { %383 = vmatpush.bf16.msra.mxu0 %v1107_v6  ;;  %v227_v23 = vrot.slane %v225_v16, 4  ;;  %v230_v24 = vrot.slane %v228_v17, 5  ;;  %v1056_v26 = vld [vmem:[%s1245_s16 + $0x14] sm:$0x1]  ;;  %v1105_v27 = vld [vmem:[%s1396_s1 + $0x20] sm:$0xff]  ;;  %v236_v29 = vrot.slane %v234_v19, 5 }
  0x14   : > { %776 = vmatpush.bf16.msra.mxu3 %v1119_v7  ;;  %v1117_v28 = vld [vmem:[%s1396_s1 + $0x60] sm:$0xff]  ;;  %v240_v30 = vrot.slane %v238_v20, 4  ;;  %v619_v31 = vshrl.u32 %v1054_v22, 16  ;;  %v622_v34 = vshll.u32 %v1054_v22, 16  ;;  %v628_v35 = vshll.u32 %v1055_v25, 16 }
  0x15   : > { %469 = vmatpush.bf16.msra.mxu1 %v1102_v8  ;;  %v1097_v32 = vld [vmem:[%s1245_s16] sm:$0xff]  ;;  %v231_v33 = vor.u32 %v230_v24, %v227_v23  ;;  %v632_v36 = vshrl.u32 %v1055_v25, 16  ;;  %v203_v37 = vld [vmem:[%s1245_s16 + $0xc] sm:$0xf]  ;;  %v246_v41 = vrot.slane %v244_v21, 5  ;;  %v638_v43 = vshll.u32 %v1056_v26, 16 }
  0x16   : > { %575 = vmatpush.bf16.msra.mxu2 %v1114_v9  ;;  %v241_v40 = vor.u32 %v240_v30, %v236_v29  ;;  %v621_v42 = vrot.slane %v619_v31, 4  ;;  %v204_v44 = vld [vmem:[%s1245_s16 + $0x10] sm:$0xf]  ;;  %v624_v46 = vrot.slane %v622_v34, 5  ;;  %v630_v47 = vrot.slane %v628_v35, 5 }
  0x17   : > { %384 = vmatpush.bf16.msra.mxu0 %v1106_v10  ;;  %v232_v45 = vrot.slane %v231_v33, 4  ;;  %v634_v48 = vrot.slane %v632_v36, 4  ;;  %v640_v50 = vrot.slane %v638_v43, 5  ;;  %v249_v51 = vshrl.u32 %v203_v37, 16  ;;  %v218_v56 = vld [vmem:[%s1245_s16 + $0x14] sm:$0x1] }
  0x18   : > { %777 = vmatpush.bf16.msra.mxu3 %v1118_v11  ;;  %v242_v49 = vrot.slane %v241_v40, 4  ;;  %v252_v52 = vshll.u32 %v203_v37, 16  ;;  %v625_v54 = vor.u32 %v624_v46, %v621_v42  ;;  %v258_v57 = vshll.u32 %v204_v44, 16  ;;  %v1057_v58 = vld [vmem:[%s1245_s16 + $0x18] sm:$0xf] }
  0x19   : > { %470 = vmatpush.bf16.msra.mxu1 %v1101_v13  ;;  %v237_v53 = vsel %vm1276_vm3, %v232_v45, %v236_v29  ;;  %v635_v55 = vor.u32 %v634_v48, %v630_v47  ;;  %v251_v61 = vrot.slane %v249_v51, 4  ;;  %v262_v4 = vshrl.u32 %v204_v44, 16  ;;  %v1058_v6 = vld [vmem:[%s1245_s16 + $0x1c] sm:$0xf]  ;;  %v1059_v15 = vld [vmem:[%s1245_s16 + $0x20] sm:$0x1] }
  0x1a   : > { %576 = vmatpush.bf16.msra.mxu2 %v1113_v18  ;;  %v247_v59 = vsel %vm1276_vm3, %v242_v49, %v246_v41  ;;  %v329_v60 = vunpack.c.l.b16 %v237_v53  ;;  %v254_v62 = vrot.slane %v252_v52, 5  ;;  %v626_v0 = vrot.slane %v625_v54, 4  ;;  %v205_v20 = vld [vmem:[%s1245_s16 + $0x18] sm:$0xf]  ;;  %v206_v25 = vld [vmem:[%s1245_s16 + $0x1c] sm:$0xf] }
  0x1b   : > { %385 = vmatpush.bf16.msra.mxu0 %v1105_v27  ;;  %v330_v63 = vunpack.c.l.b16 %v247_v59  ;;  %v636_v1 = vrot.slane %v635_v55, 4  ;;  %v260_v2 = vrot.slane %v258_v57, 5  ;;  %v268_v5 = vshll.u32 %v218_v56, 16  ;;  %v1060_v41 = vld [vmem:[%s1245_s16 + $0x24] sm:$0xf]  ;;  %v1098_v45 = vld [vmem:[%s1245_s16 + $0xc] sm:$0xff] }
  0x1c   : > { %778 = vmatpush.bf16.msra.mxu3 %v1117_v28  ;;  %998 = vmatmul.msk.bf16.vlgmr.msra.gmra.mxu1 %vm365_vm2, %v1097_v32  ;;  %v255_v3 = vor.u32 %v254_v62, %v251_v61  ;;  %v643_v7 = vshrl.u32 %v1057_v58, 16  ;;  %v631_v9 = vsel %vm1276_vm3, %v626_v0, %v630_v47  ;;  %v646_v11 = vshll.u32 %v1057_v58, 16  ;;  %v1061_v44 = vld [vmem:[%s1245_s16 + $0x28] sm:$0xf]  ;;  %v1110_v46 = vld [vmem:[%s1245_s16 + $0x18] sm:$0xff] }
  0x1d   : > { %1050 = vmatmul.msk.bf16.vlgmr.msra.gmra.mxu2 %vm365_vm2, %v1109_v38  ;;  %v337_v8 = vpack.c.b16 %v330_v63, %v329_v60  ;;  %v641_v10 = vsel %vm1276_vm3, %v636_v1, %v640_v50  ;;  %v723_v12 = vunpack.c.l.b16 %v631_v9  ;;  %v264_v14 = vrot.slane %v262_v4, 4  ;;  %v219_v56 = vld [vmem:[%s1245_s16 + $0x20] sm:$0x1]  ;;  %v1062_v4 = vld [vmem:[%s1245_s16 + $0x2c] sm:$0x1] }
  0x1e   : > { %v724_v13 = vunpack.c.l.b16 %v641_v10  ;;  %v256_v16 = vrot.slane %v255_v3, 4  ;;  %v645_v17 = vrot.slane %v643_v7, 4  ;;  %v648_v18 = vrot.slane %v646_v11, 5 }
  0x1f   : > { %962 = vmatmul.msk.bf16.vlgmr.msra.gmra.mxu0 %vm365_vm2, %v337_v8  ;;  %v652_v19 = vshll.u32 %v1058_v6, 16  ;;  %v265_v22 = vor.u32 %v264_v14, %v260_v2  ;;  %v270_v23 = vrot.slane %v268_v5, 5  ;;  %v656_v24 = vshrl.u32 %v1058_v6, 16  ;;  %v208_v14 = vld [vmem:[%s1245_s16 + $0x28] sm:$0xf] }
  0x20   : > { %v731_v21 = vpack.c.b16 %v724_v13, %v723_v12  ;;  %v649_v26 = vor.u32 %v648_v18, %v645_v17  ;;  %v662_v28 = vshll.u32 %v1059_v15, 16  ;;  %v273_v31 = vshrl.u32 %v205_v20, 16  ;;  %v207_v13 = vld [vmem:[%s1245_s16 + $0x24] sm:$0xf] }
  0x21   : > { %v654_v27 = vrot.slane %v652_v19, 5  ;;  %v266_v29 = vrot.slane %v265_v22, 4  ;;  %v658_v30 = vrot.slane %v656_v24, 4  ;;  %v276_v32 = vshll.u32 %v205_v20, 16  ;;  %v1063_v20 = vld [vmem:[%s1245_s16 + $0x30] sm:$0xf] }
  0x22   : > { %1090 = vmatmul.msk.bf16.vlgmr.msra.gmra.mxu3 %vm365_vm2, %v731_v21  ;;  %v261_v33 = vsel %vm1276_vm3, %v256_v16, %v260_v2  ;;  %v650_v34 = vrot.slane %v649_v26, 4  ;;  %v282_v35 = vshll.u32 %v206_v25, 16  ;;  %v286_v36 = vshrl.u32 %v206_v25, 16  ;;  %v1064_v25 = vld [vmem:[%s1245_s16 + $0x34] sm:$0xf]  ;;  %v1099_v26 = vld [vmem:[%s1245_s16 + $0x18] sm:$0xff] }
  0x23   : > { %v271_v37 = vsel %vm1276_vm3, %v266_v29, %v270_v23  ;;  %v659_v38 = vor.u32 %v658_v30, %v654_v27  ;;  %v664_v40 = vrot.slane %v662_v28, 5  ;;  %v275_v42 = vrot.slane %v273_v31, 4 }
  0x24   : > { %v278_v43 = vrot.slane %v276_v32, 5  ;;  %v331_v47 = vunpack.c.l.b16 %v261_v33  ;;  %v332_v48 = vunpack.c.l.b16 %v271_v37  ;;  %v655_v49 = vsel %vm1276_vm3, %v650_v34, %v654_v27  ;;  %v1111_v27 = vld [vmem:[%s1245_s16 + $0x24] sm:$0xff] }
  0x25   : > { %v660_v50 = vrot.slane %v659_v38, 4  ;;  %v284_v51 = vrot.slane %v282_v35, 5  ;;  %v288_v52 = vrot.slane %v286_v36, 4  ;;  %v667_v53 = vshrl.u32 %v1060_v41, 16 }
  0x26   : > { %v670_v54 = vshll.u32 %v1060_v41, 16  ;;  %v676_v57 = vshll.u32 %v1061_v44, 16  ;;  %v725_v58 = vunpack.c.l.b16 %v655_v49  ;;  %v279_v59 = vor.u32 %v278_v43, %v275_v42  ;;  %v220_v41 = vld [vmem:[%s1245_s16 + $0x2c] sm:$0x1] }
  0x27   : > { %v665_v55 = vsel %vm1276_vm3, %v660_v50, %v664_v40  ;;  %v669_v61 = vrot.slane %v667_v53, 4  ;;  %v680_v63 = vshrl.u32 %v1061_v44, 16  ;;  %v338_v0 = vpack.c.b16 %v332_v48, %v331_v47 }
  0x28   : > { %v726_v60 = vunpack.c.l.b16 %v665_v55  ;;  %v672_v62 = vrot.slane %v670_v54, 5  ;;  %v289_v1 = vor.u32 %v288_v52, %v284_v51  ;;  %v292_v2 = vshll.u32 %v219_v56, 16  ;;  %v1065_v52 = vld [vmem:[%s1245_s16 + $0x38] sm:$0x1] }
  0x29   : > { %v678_v3 = vrot.slane %v676_v57, 5  ;;  %v682_v5 = vrot.slane %v680_v63, 4  ;;  %v280_v7 = vrot.slane %v279_v59, 4  ;;  %v686_v12 = vshll.u32 %v1062_v4, 16 }
  0x2a   : > { %v732_v6 = vpack.c.b16 %v726_v60, %v725_v58  ;;  %v673_v8 = vor.u32 %v672_v62, %v669_v61  ;;  %v290_v9 = vrot.slane %v289_v1, 4  ;;  %v294_v10 = vrot.slane %v292_v2, 5  ;;  %v1100_v1 = vld [vmem:[%s1245_s16 + $0x24] sm:$0xff]  ;;  %v1112_v2 = vld [vmem:[%s1245_s16 + $0x30] sm:$0xff] }
  0x2b   : > { %v683_v11 = vor.u32 %v682_v5, %v678_v3  ;;  %v285_v16 = vsel %vm1276_vm3, %v280_v7, %v284_v51  ;;  %v688_v19 = vrot.slane %v686_v12, 5  ;;  %v297_v21 = vshrl.u32 %v207_v13, 16 }
  0x2c   : > { %999 = vmatmul.msk.bf16.gmra.mxu1 %vm365_vm2, %v1098_v45  ;;  %v674_v15 = vrot.slane %v673_v8, 4  ;;  %v295_v17 = vsel %vm1276_vm3, %v290_v9, %v294_v10  ;;  %v300_v22 = vshll.u32 %v207_v13, 16  ;;  %v306_v23 = vshll.u32 %v208_v14, 16 }
  0x2d   : > { %1051 = vmatmul.msk.bf16.gmra.mxu2 %vm365_vm2, %v1110_v46  ;;  %v684_v18 = vrot.slane %v683_v11, 4  ;;  %v310_v24 = vshrl.u32 %v208_v14, 16  ;;  %v333_v28 = vunpack.c.l.b16 %v285_v16  ;;  %v334_v29 = vunpack.c.l.b16 %v295_v17  ;;  %v1354_v16 = vld [vmem:[%s1397_s2] ss:$0 sm:$0xff] }
  0x2e   : > { %v679_v30 = vsel %vm1276_vm3, %v674_v15, %v678_v3  ;;  %v691_v31 = vshrl.u32 %v1063_v20, 16  ;;  %v694_v33 = vshll.u32 %v1063_v20, 16  ;;  %v700_v34 = vshll.u32 %v1064_v25, 16 }
  0x2f   : > { %963 = vmatmul.msk.bf16.gmra.mxu0 %vm365_vm2, %v338_v0  ;;  %v689_v32 = vsel %vm1276_vm3, %v684_v18, %v688_v19  ;;  %v704_v35 = vshrl.u32 %v1064_v25, 16  ;;  %v299_v36 = vrot.slane %v297_v21, 4  ;;  %v302_v37 = vrot.slane %v300_v22, 5 }
  0x30   : > { %v308_v38 = vrot.slane %v306_v23, 5  ;;  %v312_v40 = vrot.slane %v310_v24, 4  ;;  %v339_v42 = vpack.c.b16 %v334_v29, %v333_v28  ;;  %v727_v43 = vunpack.c.l.b16 %v679_v30 }
  0x31   : > { %v728_v44 = vunpack.c.l.b16 %v689_v32  ;;  %v693_v45 = vrot.slane %v691_v31, 4  ;;  %v696_v46 = vrot.slane %v694_v33, 5  ;;  %v702_v47 = vrot.slane %v700_v34, 5 }
  0x32   : > { %1091 = vmatmul.msk.bf16.gmra.mxu3 %vm365_vm2, %v732_v6  ;;  %v706_v48 = vrot.slane %v704_v35, 4  ;;  %v303_v49 = vor.u32 %v302_v37, %v299_v36  ;;  %v313_v50 = vor.u32 %v312_v40, %v308_v38  ;;  %v316_v51 = vshll.u32 %v220_v41, 16 }
  0x33   : > { %v733_v53 = vpack.c.b16 %v728_v44, %v727_v43  ;;  %v697_v54 = vor.u32 %v696_v46, %v693_v45  ;;  %v710_v56 = vshll.u32 %v1065_v52, 16 }
  0x34   : > { %v707_v55 = vor.u32 %v706_v48, %v702_v47  ;;  %v304_v57 = vrot.slane %v303_v49, 4  ;;  %v314_v58 = vrot.slane %v313_v50, 4  ;;  %v318_v59 = vrot.slane %v316_v51, 5 }
  0x35   : > { %v698_v60 = vrot.slane %v697_v54, 4  ;;  %v712_v62 = vrot.slane %v710_v56, 5 }
  0x36   : > { %v708_v61 = vrot.slane %v707_v55, 4  ;;  %v309_v63 = vsel %vm1276_vm3, %v304_v57, %v308_v38  ;;  %v319_v0 = vsel %vm1276_vm3, %v314_v58, %v318_v59 }
  0x37   : > { %v335_v3 = vunpack.c.l.b16 %v309_v63  ;;  %v336_v4 = vunpack.c.l.b16 %v319_v0  ;;  %v703_v5 = vsel %vm1276_vm3, %v698_v60, %v702_v47 }
  0x38   : > { %v713_v6 = vsel %vm1276_vm3, %v708_v61, %v712_v62  ;;  %v729_v7 = vunpack.c.l.b16 %v703_v5 }
  0x39   : > { %v730_v8 = vunpack.c.l.b16 %v713_v6  ;;  %v340_v9 = vpack.c.b16 %v336_v4, %v335_v3 }
  0x3b   : > { %v734_v10 = vpack.c.b16 %v730_v8, %v729_v7 }
  0x3c   : > { %1000 = vmatmul.msk.bf16.gmra.mxu1 %vm365_vm2, %v1099_v26 }
  0x3d   : > { %1052 = vmatmul.msk.bf16.gmra.mxu2 %vm365_vm2, %v1111_v27 }
  0x3f   : > { %964 = vmatmul.msk.bf16.gmra.mxu0 %vm365_vm2, %v339_v42 }
  0x42   : > { %1092 = vmatmul.msk.bf16.gmra.mxu3 %vm365_vm2, %v733_v53 }
  0x4c   : > { %1001 = vmatmul.msk.bf16.gmra.mxu1 %vm365_vm2, %v1100_v1 }
  0x4d   : > { %1053 = vmatmul.msk.bf16.gmra.mxu2 %vm365_vm2, %v1112_v2 }
  0x4f   : > { %965 = vmatmul.msk.bf16.gmra.mxu0 %vm365_vm2, %v340_v9 }
  0x52   : > { %1093 = vmatmul.msk.bf16.gmra.mxu3 %vm365_vm2, %v734_v10 }
  0x99   : > { %v472_v11 = vpop.f32.mrf.mxu1 }
  0x9c   : > { %v387_v12 = vpop.f32.mrf.mxu0 }
  0x9d   : > { %v473_v14 = vadd.f32 %v472_v11, %v387_v12 }
  0xa0   : > { %v578_v13 = vpop.f32.mrf.mxu2 }
  0xa1   : > { %v474_v15 = vpop.f32.mrf.mxu1  ;;  %v598_v39 = vadd.f32 %v578_v13, %v473_v14 }
  0xa4   : > { %v389_v17 = vpop.f32.mrf.mxu0 }
  0xa5   : > { %v780_v18 = vpop.f32.mrf.mxu3  ;;  %v475_v23 = vadd.f32 %v474_v15, %v389_v17 }
  0xa6   : > { %v800_v20 = vadd.f32 %v780_v18, %v598_v39 }
  0xa8   : > { %v580_v19 = vpop.f32.mrf.mxu2  ;;  %v812_v22 = vadd.f32 %v1354_v16, %v800_v20 }
  0xa9   : > { %v477_v21 = vpop.f32.mrf.mxu1  ;;  %v599_v25 = vadd.f32 %v580_v19, %v475_v23 }
  0xaa   : > { %v820_v24 = vmax.f32 %v812_v22, 0.0 }
  0xac   : > { %829 = vst.msk [vmem:[%s1361_s7] sm:$0xff] %vm828_vm4, %v820_v24  ;;  %v392_v26 = vpop.f32.mrf.mxu0 }
  0xad   : > { %v782_v27 = vpop.f32.mrf.mxu3  ;;  %v478_v30 = vadd.f32 %v477_v21, %v392_v26 }
  0xae   : > { %v801_v29 = vadd.f32 %v782_v27, %v599_v25 }
  0xb0   : > { %v583_v28 = vpop.f32.mrf.mxu2  ;;  %v813_v32 = vadd.f32 %v1354_v16, %v801_v29 }
  0xb1   : > { %v479_v31 = vpop.f32.mrf.mxu1  ;;  %v600_v34 = vadd.f32 %v583_v28, %v478_v30 }
  0xb2   : > { %v821_v33 = vmax.f32 %v813_v32, 0.0 }
  0xb4   : > { %830 = vst.msk [vmem:[%s1361_s7 + $0x8] sm:$0xff] %vm828_vm4, %v821_v33  ;;  %v394_v35 = vpop.f32.mrf.mxu0 }
  0xb5   : > { %v785_v36 = vpop.f32.mrf.mxu3  ;;  %v480_v41 = vadd.f32 %v479_v31, %v394_v35 }
  0xb6   : > { %v802_v38 = vadd.f32 %v785_v36, %v600_v34 }
  0xb8   : > { %v585_v37 = vpop.f32.mrf.mxu2  ;;  %v814_v40 = vadd.f32 %v1354_v16, %v802_v38 }
  0xb9   : > { %v482_v42 = vpop.f32.mrf.mxu1  ;;  %v601_v44 = vadd.f32 %v585_v37, %v480_v41 }
  0xba   : > { %v822_v43 = vmax.f32 %v814_v40, 0.0 }
  0xbc   : > { %831 = vst.msk [vmem:[%s1361_s7 + $0x10] sm:$0xff] %vm828_vm4, %v822_v43  ;;  %v397_v45 = vpop.f32.mrf.mxu0 }
  0xbd   : > { %v787_v46 = vpop.f32.mrf.mxu3  ;;  %v483_v49 = vadd.f32 %v482_v42, %v397_v45 }
  0xbe   : > { %v803_v48 = vadd.f32 %v787_v46, %v601_v44 }
  0xc0   : > { %v588_v47 = vpop.f32.mrf.mxu2  ;;  %v815_v50 = vadd.f32 %v1354_v16, %v803_v48 }
  0xc1   : > { %v602_v52 = vadd.f32 %v588_v47, %v483_v49  ;;  %v484_v53 = vpop.f32.mrf.mxu1 }
  0xc2   : > { %v823_v51 = vmax.f32 %v815_v50, 0.0 }
  0xc4   : > { %832 = vst.msk [vmem:[%s1361_s7 + $0x18] sm:$0xff] %vm828_vm4, %v823_v51  ;;  %v399_v54 = vpop.f32.mrf.mxu0 }
  0xc5   : > { %v790_v55 = vpop.f32.mrf.mxu3  ;;  %v485_v59 = vadd.f32 %v484_v53, %v399_v54 }
  0xc6   : > { %v804_v57 = vadd.f32 %v790_v55, %v602_v52 }
  0xc8   : > { %v590_v56 = vpop.f32.mrf.mxu2  ;;  %v816_v58 = vadd.f32 %v1354_v16, %v804_v57 }
  0xc9   : > { %v603_v61 = vadd.f32 %v590_v56, %v485_v59  ;;  %v487_v63 = vpop.f32.mrf.mxu1 }
  0xca   : > { %v824_v60 = vmax.f32 %v816_v58, 0.0 }
  0xcc   : > { %833 = vst.msk [vmem:[%s1361_s7 + $0x20] sm:$0xff] %vm828_vm4, %v824_v60  ;;  %v402_v62 = vpop.f32.mrf.mxu0 }
  0xcd   : > { %v792_v0 = vpop.f32.mrf.mxu3  ;;  %v488_v2 = vadd.f32 %v487_v63, %v402_v62 }
  0xce   : > { %v805_v1 = vadd.f32 %v792_v0, %v603_v61 }
  0xd0   : > { %v593_v3 = vpop.f32.mrf.mxu2  ;;  %v817_v4 = vadd.f32 %v1354_v16, %v805_v1 }
  0xd1   : > { %v604_v6 = vadd.f32 %v593_v3, %v488_v2  ;;  %v489_v10 = vpop.f32.mrf.mxu1 }
  0xd2   : > { %v825_v5 = vmax.f32 %v817_v4, 0.0 }
  0xd4   : > { %834 = vst.msk [vmem:[%s1361_s7 + $0x28] sm:$0xff] %vm828_vm4, %v825_v5  ;;  %v404_v8 = vpop.f32.mrf.mxu0 }
  0xd5   : > { %v795_v7 = vpop.f32.mrf.mxu3  ;;  %v490_v12 = vadd.f32 %v489_v10, %v404_v8 }
  0xd6   : > { %v806_v9 = vadd.f32 %v795_v7, %v604_v6 }
  0xd8   : > { %v818_v11 = vadd.f32 %v1354_v16, %v806_v9  ;;  %v595_v13 = vpop.f32.mrf.mxu2 }
  0xd9   : > { %v605_v15 = vadd.f32 %v595_v13, %v490_v12 }
  0xda   : > { %v826_v14 = vmax.f32 %v818_v11, 0.0 }
  0xdc   : > { %835 = vst.msk [vmem:[%s1361_s7 + $0x30] sm:$0xff] %vm828_vm4, %v826_v14 }
  0xdd   : > { %v797_v39 = vpop.f32.mrf.mxu3 }
  0xde   : > { %v807_v17 = vadd.f32 %v797_v39, %v605_v15 }
  0xe0   : > { %v819_v18 = vadd.f32 %v1354_v16, %v807_v17 }
  0xe2   : > { %v827_v19 = vmax.f32 %v819_v18, 0.0 }
  0xe4   : > { %836 = vst.msk [vmem:[%s1361_s7 + $0x38] sm:$0xff] %vm828_vm4, %v827_v19 }
  0xe5 PF: > { %s13_s14 = sadd.s32 1, %s1169_s14   ;;  %s1401_s12 = smov %s1165_s13 }
  0xe6   : > { %p10_p5 = scmp.ge.s32.totalorder %s13_s14, 4   ;;  %s1402_s13 = smov %s1404_s15 }
  0xe8   :  { %12 = sbr.rel (!%p10_p5) target bundleno = 2 (0x2), region = 67 }

// kernel: _forward.5
= control target key start
LH: loop header
LB: loop body
LE: loop exit
PB: predicated region body
PF: predicated region fallthrough
CT: control target
= control target key end

     0   :  { %s1131_s12 = smov 0   ;;  %s1133_s13 = smov 0   ;;  %s1317_s0 = inlined_call_operand.vmem [shape: bf16[2,3,17,128], index: 0, kind: input, shape index: {}]   ;;  %s1318_s1 = inlined_call_operand.vmem [shape: bf16[4,128,64], index: 1, kind: input, shape index: {}]   ;;  %s1319_s2 = inlined_call_operand.vmem [shape: f32[1,64], index: 2, kind: input, shape index: {}]   ;;  %s1320_s3 = inlined_call_operand.vmem [shape: f32[2,2,16,64], index: 3, kind: output, shape index: {}]  }
   0x1   :  { %s1135_s14 = smov 0  }
   0x2 LB: > { %s25_s15 = sadd.s32 1, %s1105_s13  ;;  %p816_p0 = scmp.ge.s32.totalorder %s1109_s14, 1  ;;  %s1109_s14 = sphi %s1135_s14, %s13_s14   ;;  %s1105_s13 = sphi %s1133_s13, %s1324_s13   ;;  %s1101_s12 = sphi %s1131_s12, %s1323_s12  }
   0x3   : > { %p27_p1 = scmp.ge.s32.totalorder %s25_s15, 2  ;;  %p151_p2 = scmp.lt.s32.totalorder %s1109_s14, 3 }
   0x5   : > { %s1326_s15 = smov (%p27_p1, %s25_s15), 0  ;;  %p152_p3 = pnand %p816_p0, %p151_p2 }
   0x6   : > { %p180_p4 = scmp.lt.s32.totalorder (!%p152_p3), %s1101_s12, 1 }
   0x7   : > { %155 = sbr.rel (%p152_p3) target bundleno = 211 (0xd3), region = 32 }
   0xc   : > { %v1042_v0 = vld [vmem:[%s1318_s1 + $0x78] sm:$0xff]  ;;  %v1041_v4 = vld [vmem:[%s1318_s1 + $0x70] sm:$0xff]  ;;  %s1328_s12 = smov (!%p180_p4, %s1101_s12), 1  ;;  %v1040_v8 = vld [vmem:[%s1318_s1 + $0x68] sm:$0xff]  ;;  %vm222_vm0 = vsmask.f32 3328 }
   0xd   : > { %v1034_v1 = vld [vmem:[%s1318_s1 + $0x38] sm:$0xff]  ;;  %346 = vmatpush.bf16.msra.mxu0 %v1042_v0  ;;  %v1033_v5 = vld [vmem:[%s1318_s1 + $0x30] sm:$0xff]  ;;  %s1061_s5 = smul.u32 36, %s1328_s12  ;;  %v1032_v9 = vld [vmem:[%s1318_s1 + $0x28] sm:$0xff]  ;;  %vm223_vm1 = vsmask.f32 7440 }
   0xe   : > { %v1052_v2 = vld [vmem:[%s1318_s1 + $0xb8] sm:$0xff]  ;;  %425 = vmatpush.bf16.msra.mxu1 %v1034_v1  ;;  %v1051_v6 = vld [vmem:[%s1318_s1 + $0xb0] sm:$0xff]  ;;  %v1050_v10 = vld [vmem:[%s1318_s1 + $0xa8] sm:$0xff]  ;;  %s1024_s18 = sshll.u32 %s1328_s12, 5  ;;  %vm714_vm3 = vcmask 523264  }
   0xf   : > { %v1060_v3 = vld [vmem:[%s1318_s1 + $0xf8] sm:$0xff]  ;;  %529 = vmatpush.bf16.msra.mxu2 %v1052_v2  ;;  %v1059_v7 = vld [vmem:[%s1318_s1 + $0xf0] sm:$0xff]  ;;  %v1058_v11 = vld [vmem:[%s1318_s1 + $0xe8] sm:$0xff]  ;;  %s1191_s20 = scalar_lea.vmem %s1317_s0, %s1061_s5  ;;  %s1298_s21 = scalar_lea.vmem %s1320_s3, %s1024_s18 }
  0x10   : > { %679 = vmatpush.bf16.msra.mxu3 %v1060_v3  ;;  %v1039_v12 = vld [vmem:[%s1318_s1 + $0x60] sm:$0xff]  ;;  %v220_v18 = vld [vmem:[%s1191_s20 + $0x8] sm:$0x1]  ;;  %v1038_v21 = vld [vmem:[%s1318_s1 + $0x58] sm:$0xff] }
  0x11   : > { %347 = vmatpush.bf16.msra.mxu0 %v1041_v4  ;;  %v1031_v13 = vld [vmem:[%s1318_s1 + $0x20] sm:$0xff]  ;;  %v1030_v22 = vld [vmem:[%s1318_s1 + $0x18] sm:$0xff]  ;;  %v968_v27 = vld [vmem:[%s1191_s20 + $0xc] sm:$0xf]  ;;  %v245_v31 = vshll.u32 %v220_v18, 16 }
  0x12   : > { %426 = vmatpush.bf16.msra.mxu1 %v1033_v5  ;;  %v1049_v14 = vld [vmem:[%s1318_s1 + $0xa0] sm:$0xff]  ;;  %v969_v28 = vld [vmem:[%s1191_s20 + $0x10] sm:$0xf]  ;;  %v970_v32 = vld [vmem:[%s1191_s20 + $0x14] sm:$0x1]  ;;  %v559_v33 = vshrl.u32 %v968_v27, 16 }
  0x13   : > { %530 = vmatpush.bf16.msra.mxu2 %v1051_v6  ;;  %v1057_v15 = vld [vmem:[%s1318_s1 + $0xe0] sm:$0xff]  ;;  %v1048_v34 = vld [vmem:[%s1318_s1 + $0x98] sm:$0xff]  ;;  %v562_v37 = vshll.u32 %v968_v27, 16  ;;  %v568_v38 = vshll.u32 %v969_v28, 16  ;;  %v572_v39 = vshrl.u32 %v969_v28, 16  ;;  %v1037_v40 = vld [vmem:[%s1318_s1 + $0x50] sm:$0xff] }
  0x14   : > { %680 = vmatpush.bf16.msra.mxu3 %v1059_v7  ;;  %v200_v16 = vld [vmem:[%s1191_s20] sm:$0xf]  ;;  %v201_v17 = vld [vmem:[%s1191_s20 + $0x4] sm:$0xf]  ;;  %v1056_v35 = vld [vmem:[%s1318_s1 + $0xd8] sm:$0xff]  ;;  %v561_v42 = vrot.slane %v559_v33, 4 }
  0x15   : > { %348 = vmatpush.bf16.msra.mxu0 %v1040_v8  ;;  %v226_v19 = vshrl.u32 %v200_v16, 16  ;;  %v229_v20 = vshll.u32 %v200_v16, 16  ;;  %v235_v23 = vshll.u32 %v201_v17, 16  ;;  %v239_v24 = vshrl.u32 %v201_v17, 16  ;;  %v202_v48 = vld [vmem:[%s1191_s20 + $0xc] sm:$0xf]  ;;  %vm1232_vm2 = vmor %vm222_vm0, %vm223_vm1 }
  0x16   : > { %427 = vmatpush.bf16.msra.mxu1 %v1032_v9  ;;  %v578_v43 = vshll.u32 %v970_v32, 16  ;;  %v564_v45 = vrot.slane %v562_v37, 5  ;;  %v570_v46 = vrot.slane %v568_v38, 5  ;;  %v574_v47 = vrot.slane %v572_v39, 4  ;;  %v1029_v49 = vld [vmem:[%s1318_s1 + $0x10] sm:$0xff]  ;;  %v1036_v2 = vld [vmem:[%s1318_s1 + $0x48] sm:$0xff] }
  0x17   : > { %531 = vmatpush.bf16.msra.mxu2 %v1050_v10  ;;  %v228_v25 = vrot.slane %v226_v19, 4  ;;  %v231_v26 = vrot.slane %v229_v20, 5  ;;  %v237_v29 = vrot.slane %v235_v23, 5  ;;  %v241_v30 = vrot.slane %v239_v24, 4  ;;  %v203_v53 = vld [vmem:[%s1191_s20 + $0x10] sm:$0xf] }
  0x18   : > { %681 = vmatpush.bf16.msra.mxu3 %v1058_v11  ;;  %v247_v52 = vrot.slane %v245_v31, 5  ;;  %v1047_v54 = vld [vmem:[%s1318_s1 + $0x90] sm:$0xff]  ;;  %v565_v56 = vor.u32 %v564_v45, %v561_v42  ;;  %v575_v57 = vor.u32 %v574_v47, %v570_v46  ;;  %v580_v58 = vrot.slane %v578_v43, 5  ;;  %v971_v61 = vld [vmem:[%s1191_s20 + $0x18] sm:$0xf]  ;;  %v1028_v3 = vld [vmem:[%s1318_s1 + $0x8] sm:$0xff] }
  0x19   : > { %349 = vmatpush.bf16.msra.mxu0 %v1039_v12  ;;  %v232_v36 = vor.u32 %v231_v26, %v228_v25  ;;  %v242_v41 = vor.u32 %v241_v30, %v237_v29  ;;  %v1055_v55 = vld [vmem:[%s1318_s1 + $0xd0] sm:$0xff]  ;;  %v250_v59 = vshrl.u32 %v202_v48, 16  ;;  %v253_v60 = vshll.u32 %v202_v48, 16  ;;  %v972_v6 = vld [vmem:[%s1191_s20 + $0x1c] sm:$0xf]  ;;  %v1046_v7 = vld [vmem:[%s1318_s1 + $0x88] sm:$0xff] }
  0x1a   : > { %428 = vmatpush.bf16.msra.mxu1 %v1031_v13  ;;  %v566_v63 = vrot.slane %v565_v56, 4  ;;  %v576_v0 = vrot.slane %v575_v57, 4  ;;  %v259_v1 = vshll.u32 %v203_v53, 16  ;;  %v263_v5 = vshrl.u32 %v203_v53, 16  ;;  %v1054_v8 = vld [vmem:[%s1318_s1 + $0xc8] sm:$0xff]  ;;  %v1035_v19 = vld [vmem:[%s1318_s1 + $0x40] sm:$0xff] }
  0x1b   : > { %532 = vmatpush.bf16.msra.mxu2 %v1049_v14  ;;  %v233_v44 = vrot.slane %v232_v36, 4  ;;  %v243_v51 = vrot.slane %v242_v41, 4  ;;  %v583_v11 = vshrl.u32 %v971_v61, 16  ;;  %v586_v12 = vshll.u32 %v971_v61, 16  ;;  %v1027_v20 = vld [vmem:[%s1318_s1] sm:$0xff] }
  0x1c   : > { %682 = vmatpush.bf16.msra.mxu3 %v1057_v15  ;;  %v571_v9 = vsel %vm1232_vm2, %v566_v63, %v570_v46  ;;  %v581_v10 = vsel %vm1232_vm2, %v576_v0, %v580_v58  ;;  %v252_v14 = vrot.slane %v250_v59, 4  ;;  %v255_v16 = vrot.slane %v253_v60, 5  ;;  %v1053_v26 = vld [vmem:[%s1318_s1 + $0xc0] sm:$0xff]  ;;  %v221_v27 = vld [vmem:[%s1191_s20 + $0x14] sm:$0x1]  ;;  %v1026_v59 = vld [vmem:[%s1191_s20 + $0xc] sm:$0xff] }
  0x1d   : > { %350 = vmatpush.bf16.msra.mxu0 %v1038_v21  ;;  %v238_v62 = vsel %vm1232_vm2, %v233_v44, %v237_v29  ;;  %v248_v4 = vsel %vm1232_vm2, %v243_v51, %v247_v52  ;;  %v261_v17 = vrot.slane %v259_v1, 5  ;;  %v592_v18 = vshll.u32 %v972_v6, 16  ;;  %v1045_v21 = vld [vmem:[%s1318_s1 + $0x80] sm:$0xff]  ;;  %v1044_v60 = vld [vmem:[%s1191_s20 + $0x18] sm:$0xff] }
  0x1e   : > { %429 = vmatpush.bf16.msra.mxu1 %v1030_v22  ;;  %v290_v13 = vunpack.c.l.b16 %v238_v62  ;;  %v291_v15 = vunpack.c.l.b16 %v248_v4  ;;  %v623_v22 = vunpack.c.l.b16 %v571_v9  ;;  %v624_v23 = vunpack.c.l.b16 %v581_v10  ;;  %v973_v31 = vld [vmem:[%s1191_s20 + $0x20] sm:$0x1] }
  0x1f   : > { %533 = vmatpush.bf16.msra.mxu2 %v1048_v34  ;;  %v265_v24 = vrot.slane %v263_v5, 4  ;;  %v596_v25 = vshrl.u32 %v972_v6, 16  ;;  %v585_v28 = vrot.slane %v583_v11, 4  ;;  %v588_v29 = vrot.slane %v586_v12, 5  ;;  %v1025_v34 = vld [vmem:[%s1191_s20] sm:$0xff] }
  0x20   : > { %683 = vmatpush.bf16.msra.mxu3 %v1056_v35  ;;  %v594_v30 = vrot.slane %v592_v18, 5  ;;  %v294_v33 = vpack.c.b16 %v291_v15, %v290_v13  ;;  %v1043_v35 = vld [vmem:[%s1191_s20 + $0xc] sm:$0xff]  ;;  %v627_v36 = vpack.c.b16 %v624_v23, %v623_v22  ;;  %v256_v37 = vor.u32 %v255_v16, %v252_v14 }
  0x21   : > { %351 = vmatpush.bf16.msra.mxu0 %v1037_v40  ;;  %v598_v32 = vrot.slane %v596_v25, 4  ;;  %v266_v38 = vor.u32 %v265_v24, %v261_v17  ;;  %v269_v39 = vshll.u32 %v221_v27, 16  ;;  %v589_v40 = vor.u32 %v588_v29, %v585_v28 }
  0x22   : > { %430 = vmatpush.bf16.msra.mxu1 %v1029_v49  ;;  %v602_v42 = vshll.u32 %v973_v31, 16  ;;  %v257_v43 = vrot.slane %v256_v37, 4 }
  0x23   : > { %534 = vmatpush.bf16.msra.mxu2 %v1047_v54  ;;  %v599_v41 = vor.u32 %v598_v32, %v594_v30  ;;  %v267_v44 = vrot.slane %v266_v38, 4  ;;  %v271_v45 = vrot.slane %v269_v39, 5  ;;  %v590_v46 = vrot.slane %v589_v40, 4 }
  0x24   : > { %684 = vmatpush.bf16.msra.mxu3 %v1055_v55  ;;  %v604_v48 = vrot.slane %v602_v42, 5  ;;  %v262_v49 = vsel %vm1232_vm2, %v257_v43, %v261_v17 }
  0x25   : > { %352 = vmatpush.bf16.msra.mxu0 %v1036_v2  ;;  %v600_v47 = vrot.slane %v599_v41, 4  ;;  %v272_v51 = vsel %vm1232_vm2, %v267_v44, %v271_v45  ;;  %v595_v52 = vsel %vm1232_vm2, %v590_v46, %v594_v30  ;;  %v292_v54 = vunpack.c.l.b16 %v262_v49 }
  0x26   : > { %431 = vmatpush.bf16.msra.mxu1 %v1028_v3  ;;  %v293_v55 = vunpack.c.l.b16 %v272_v51  ;;  %v625_v56 = vunpack.c.l.b16 %v595_v52  ;;  %v1086_v3 = vld [vmem:[%s1319_s2] ss:$0 sm:$0xff] }
  0x27   : > { %535 = vmatpush.bf16.msra.mxu2 %v1046_v7  ;;  %v605_v53 = vsel %vm1232_vm2, %v600_v47, %v604_v48 }
  0x28   : > { %685 = vmatpush.bf16.msra.mxu3 %v1054_v8  ;;  %v626_v57 = vunpack.c.l.b16 %v605_v53  ;;  %v295_v58 = vpack.c.b16 %v293_v55, %v292_v54 }
  0x29   : > { %353 = vmatpush.bf16.msra.mxu0 %v1035_v19 }
  0x2a   : > { %432 = vmatpush.bf16.msra.mxu1 %v1027_v20  ;;  %v628_v61 = vpack.c.b16 %v626_v57, %v625_v56 }
  0x2b   : > { %536 = vmatpush.bf16.msra.mxu2 %v1045_v21 }
  0x2c   : > { %686 = vmatpush.bf16.msra.mxu3 %v1053_v26  ;;  %354 = vmatmul.bf16.vlgmr.msra.gmra.mxu0 %v294_v33 }
  0x2d   : > { %433 = vmatmul.bf16.vlgmr.msra.gmra.mxu1 %v1025_v34 }
  0x2e   : > { %537 = vmatmul.bf16.vlgmr.msra.gmra.mxu2 %v1043_v35 }
  0x2f   : > { %687 = vmatmul.bf16.vlgmr.msra.gmra.mxu3 %v627_v36 }
  0x3c   : > { %359 = vmatmul.bf16.gmra.mxu0 %v295_v58 }
  0x3d   : > { %438 = vmatmul.bf16.gmra.mxu1 %v1026_v59 }
  0x3e   : > { %542 = vmatmul.bf16.gmra.mxu2 %v1044_v60 }
  0x3f   : > { %692 = vmatmul.bf16.gmra.mxu3 %v628_v61 }
  0xa9   : > { %v355_v62 = vpop.f32.mrf.mxu0 }
  0xaa   : > { %v434_v63 = vpop.f32.mrf.mxu1 }
  0xab   : > { %v435_v0 = vadd.f32 %v434_v63, %v355_v62 }
  0xb1   : > { %v538_v1 = vpop.f32.mrf.mxu2  ;;  %v357_v4 = vpop.f32.mrf.mxu0 }
  0xb2   : > { %v688_v2 = vpop.f32.mrf.mxu3  ;;  %v548_v50 = vadd.f32 %v538_v1, %v435_v0  ;;  %v436_v5 = vpop.f32.mrf.mxu1 }
  0xb3   : > { %v437_v9 = vadd.f32 %v436_v5, %v357_v4 }
  0xb4   : > { %v698_v6 = vadd.f32 %v688_v2, %v548_v50 }
  0xb6   : > { %v706_v7 = vadd.f32 %v1086_v3, %v698_v6 }
  0xb8   : > { %v710_v8 = vmax.f32 %v706_v7, 0.0 }
  0xb9   : > { %v540_v10 = vpop.f32.mrf.mxu2  ;;  %v360_v13 = vpop.f32.mrf.mxu0 }
  0xba   : > { %v690_v11 = vpop.f32.mrf.mxu3  ;;  %715 = vst.msk [vmem:[%s1298_s21] sm:$0xff] %vm714_vm3, %v710_v8  ;;  %v549_v12 = vadd.f32 %v540_v10, %v437_v9  ;;  %v439_v14 = vpop.f32.mrf.mxu1 }
  0xbb   : > { %v440_v17 = vadd.f32 %v439_v14, %v360_v13 }
  0xbc   : > { %v699_v15 = vadd.f32 %v690_v11, %v549_v12 }
  0xbe   : > { %v707_v16 = vadd.f32 %v1086_v3, %v699_v15 }
  0xc0   : > { %v711_v18 = vmax.f32 %v707_v16, 0.0 }
  0xc1   : > { %v543_v19 = vpop.f32.mrf.mxu2  ;;  %v362_v23 = vpop.f32.mrf.mxu0 }
  0xc2   : > { %v693_v20 = vpop.f32.mrf.mxu3  ;;  %716 = vst.msk [vmem:[%s1298_s21 + $0x8] sm:$0xff] %vm714_vm3, %v711_v18  ;;  %v550_v21 = vadd.f32 %v543_v19, %v440_v17  ;;  %v441_v24 = vpop.f32.mrf.mxu1 }
  0xc3   : > { %v442_v27 = vadd.f32 %v441_v24, %v362_v23 }
  0xc4   : > { %v700_v22 = vadd.f32 %v693_v20, %v550_v21 }
  0xc6   : > { %v708_v25 = vadd.f32 %v1086_v3, %v700_v22 }
  0xc8   : > { %v712_v26 = vmax.f32 %v708_v25, 0.0 }
  0xc9   : > { %v545_v28 = vpop.f32.mrf.mxu2 }
  0xca   : > { %717 = vst.msk [vmem:[%s1298_s21 + $0x10] sm:$0xff] %vm714_vm3, %v712_v26  ;;  %v551_v29 = vadd.f32 %v545_v28, %v442_v27  ;;  %v695_v30 = vpop.f32.mrf.mxu3 }
  0xcc   : > { %v701_v31 = vadd.f32 %v695_v30, %v551_v29 }
  0xce   : > { %v709_v32 = vadd.f32 %v1086_v3, %v701_v31 }
  0xd0   : > { %v713_v33 = vmax.f32 %v709_v32, 0.0 }
  0xd2   : > { %718 = vst.msk [vmem:[%s1298_s21 + $0x18] sm:$0xff] %vm714_vm3, %v713_v33 }
  0xd3 PF: > { %s13_s14 = sadd.s32 1, %s1109_s14   ;;  %s1323_s12 = smov %s1105_s13 }
  0xd4   : > { %p10_p5 = scmp.ge.s32.totalorder %s13_s14, 4   ;;  %s1324_s13 = smov %s1326_s15 }
  0xd6   :  { %12 = sbr.rel (!%p10_p5) target bundleno = 2 (0x2), region = 67 }

</bundles_post_ra>
